<compile_context>
chip_gen: v6e
topology: v6e:2x2x1
jax: 0.10.0
libtpu: 0.0.40
codegen_flags: <defaults>
</compile_context>

<pallas_src>
import functools

import jax
import jax.numpy as jnp
from jax.experimental import pallas as pl
from jax.experimental.pallas import tpu as pltpu


LANE = 128          # TPU lane width; hidden & output slabs are padded to this
FUSE_MAX_N = 2048   # fused single-call path (A_hat resident in VMEM) up to here


# ----------------------------- kernel helpers ------------------------------ #

def _finalize(pre, c_out, r):
    """lanes [0, c_out) -> L2-normalized mu; lane c_out -> softplus + r; rest 0."""
    lane = jax.lax.broadcasted_iota(jnp.int32, pre.shape, 1)
    mu_mask = lane < c_out
    k_mask = lane == c_out
    # row-wise L2 norm over the mu lanes only; exact division by the norm
    # matches `mu = mu / mu.norm(dim=1, keepdim=True)` in the reference.
    sq = jnp.sum(jnp.where(mu_mask, pre * pre, 0.0), axis=1, keepdims=True)
    mu_val = pre * jax.lax.rsqrt(sq)
    # softplus(x) = max(x, 0) + log1p(exp(-|x|))  (log1p per perf review)
    k_val = jnp.maximum(pre, 0.0) + jnp.log1p(jnp.exp(-jnp.abs(pre))) + r
    return jnp.where(mu_mask, mu_val, jnp.where(k_mask, k_val, 0.0))


# ----------------------- fused kernel (small N path) ----------------------- #

def fused_kernel(xw_ref, a_ref, b1_ref, wcat_ref, bcat_ref, out_ref, *, c_out, r):
    """out = finalize(A @ (relu(A @ xw + b1) @ [Wmu|Wk]) + [bmu|bk]).

    Single launch, A_hat resident in VMEM, hw stays on-chip in f32 (no bf16
    HBM round-trip between the two GCN layers).
    """
    a = a_ref[...]                                                 # bf16 [N, N]
    h = jnp.dot(a, xw_ref[...], preferred_element_type=jnp.float32) + b1_ref[...]
    h = jnp.maximum(h, 0.0)                                        # ReLU (f32)
    hw = jnp.dot(h.astype(jnp.bfloat16), wcat_ref[...],
                 preferred_element_type=jnp.float32)               # [N, 128]
    pre = jnp.dot(a, hw.astype(jnp.bfloat16),
                  preferred_element_type=jnp.float32) + bcat_ref[...]
    out_ref[...] = _finalize(pre, c_out, r)


# --------------------- two-phase kernels (large N path) -------------------- #

def phase1_kernel(a_ref, xw_ref, b1_ref, wcat_ref, hw_ref):
    """hw_tile = relu(A_tile @ xw + b1) @ [Wmu | Wk]   (bf16 out, padded)."""
    h = jnp.dot(a_ref[...], xw_ref[...],
                preferred_element_type=jnp.float32) + b1_ref[...]
    h = jnp.maximum(h, 0.0)
    hw = jnp.dot(h.astype(jnp.bfloat16), wcat_ref[...],
                 preferred_element_type=jnp.float32)
    hw_ref[...] = hw.astype(hw_ref.dtype)


def phase2_kernel(a_ref, hw_ref, bcat_ref, out_ref, *, c_out, r):
    """out_tile = finalize(A_tile @ hw + [bmu|bk])  as a lane-dense slab."""
    pre = jnp.dot(a_ref[...], hw_ref[...],
                  preferred_element_type=jnp.float32) + bcat_ref[...]
    out_ref[...] = _finalize(pre, c_out, r)


# -------------------------------- wrapper ----------------------------------- #

def _pick_tm(n, a_tile_budget=36 << 20):
    """Largest row tile whose double-buffered bf16 A stream fits the budget
    (budget chosen so the tiling also fits v7x's 64 MiB VMEM per TC)."""
    for tm in (512, 256, 128, 64, 32, 16, 8):
        if tm <= n and n % tm == 0 and 4 * tm * n <= a_tile_budget:
            return tm
    raise ValueError(f"cannot row-tile N={n}; N must be a multiple of 8")


def encoder_forward_pallas(dropout_key, x, a_hat, params, *, r=10.0, dropout_p=0.1):
    n, c_in = x.shape
    c_hid = params["w1"].shape[1]
    c_out = params["wmu"].shape[1]
    assert c_hid <= LANE and c_out + 1 <= LANE

    # --- dropout (train mode, scaled by 1/(1-p)), applied ONCE wrapper-side ---
    if dropout_p > 0.0:
        keep = jax.random.bernoulli(dropout_key, 1.0 - dropout_p, x.shape)
        x_drop = x * keep.astype(x.dtype) / (1.0 - dropout_p)
    else:
        x_drop = x

    # --- pad / fuse parameters into lane-dense slabs ---
    w1_pad = jnp.zeros((c_in, LANE), jnp.float32).at[:, :c_hid].set(params["w1"])
    b1_pad = jnp.zeros((1, LANE), jnp.float32).at[:, :c_hid].set(params["b1"])
    wcat = jnp.concatenate([params["wmu"], params["wk"]], axis=1)   # [c_hid, c_out+1]
    bcat = jnp.concatenate([params["bmu"], params["bk"]], axis=1)   # [1,     c_out+1]
    wcat_pad = jnp.zeros((LANE, LANE), jnp.float32).at[:c_hid, :c_out + 1].set(wcat)
    bcat_pad = jnp.zeros((1, LANE), jnp.float32).at[:, :c_out + 1].set(bcat)

    # --- hoisted once (perf review): xw = dropout(x) @ W1 (K = c_in is tiny) ---
    xw = jnp.dot(x_drop, w1_pad).astype(jnp.bfloat16)               # [N, 128]

    a_bf = a_hat.astype(jnp.bfloat16)      # halves A traffic, full-rate on MXU
    wcat_bf = wcat_pad.astype(jnp.bfloat16)

    if n <= FUSE_MAX_N:
        # ---------------- single fused call, A_hat resident -----------------
        need = (2 * n * n           # A_hat bf16 (resident)
                + 2 * n * LANE      # xw bf16
                + 4 * n * LANE      # hw f32 (kernel-internal)
                + 4 * n * LANE      # out f32
                + 6 * LANE * LANE)  # padded weights / biases
        vmem_limit = max(32 << 20, need + (4 << 20))
        out = pl.pallas_call(
            functools.partial(fused_kernel, c_out=c_out, r=float(r)),
            out_shape=jax.ShapeDtypeStruct((n, LANE), jnp.float32),
            compiler_params=pltpu.CompilerParams(vmem_limit_bytes=vmem_limit),
        )(xw, a_bf, b1_pad, wcat_bf, bcat_pad)
    else:
        # -------- two-phase row-tiled fallback for large N (A streamed) ------
        tm = _pick_tm(n)
        grid = (n // tm,)

        def resident(shape):
            # constant-index blocks never change -> single-buffer them
            return pl.BlockSpec(shape, lambda i: (0, 0),
                                pipeline_mode=pl.Buffered(1))

        vmem_limit = max(32 << 20,
                         4 * tm * n            # double-buffered bf16 A tile
                         + 2 * n * LANE        # resident xw / hw (bf16)
                         + 8 * tm * LANE       # output tiles (f32, 2 buffers)
                         + (4 << 20))
        cp = pltpu.CompilerParams(dimension_semantics=("parallel",),
                                  vmem_limit_bytes=vmem_limit)

        # Phase 1: hw = relu(A @ xw + b1) @ [Wmu | Wk]       (bf16 to HBM)
        hw = pl.pallas_call(
            phase1_kernel,
            out_shape=jax.ShapeDtypeStruct((n, LANE), jnp.bfloat16),
            grid=grid,
            in_specs=[
                pl.BlockSpec((tm, n), lambda i: (i, 0)),   # A_hat row tile
                resident((n, LANE)),                        # xw
                resident((1, LANE)),                        # b1
                resident((LANE, LANE)),                     # [Wmu | Wk]
            ],
            out_specs=pl.BlockSpec((tm, LANE), lambda i: (i, 0)),
            compiler_params=cp,
        )(a_bf, xw, b1_pad, wcat_bf)

        # Phase 2: out = finalize(A @ hw + [bmu|bk])  -> lane-dense [N,128] slab
        out = pl.pallas_call(
            functools.partial(phase2_kernel, c_out=c_out, r=float(r)),
            out_shape=jax.ShapeDtypeStruct((n, LANE), jnp.float32),
            grid=grid,
            in_specs=[
                pl.BlockSpec((tm, n), lambda i: (i, 0)),   # A_hat row tile
                resident((n, LANE)),                        # hw
                resident((1, LANE)),                        # [bmu | bk]
            ],
            out_specs=pl.BlockSpec((tm, LANE), lambda i: (i, 0)),
            compiler_params=cp,
        )(a_bf, hw, bcat_pad)

    mu = out[:, :c_out]
    k = out[:, c_out:c_out + 1]
    return mu, k


# ----------------------------- plain-JAX glue ------------------------------- #

def gcn_norm_dense(edge_index, num_nodes):
    """Dense D^{-1/2}(A+I)D^{-1/2} as used by PyG GCNConv.

    Note: adds I unconditionally and collapses duplicate edges; edge_index must
    not already contain self-loops (matches PyG gcn_norm under that condition).
    """
    a = jnp.zeros((num_nodes, num_nodes), jnp.float32)
    a = a.at[edge_index[0], edge_index[1]].set(1.0)
    a = a + jnp.eye(num_nodes, dtype=jnp.float32)
    deg = a.sum(axis=1)
    d_inv_sqrt = 1.0 / jnp.sqrt(deg)
    return d_inv_sqrt[:, None] * a * d_inv_sqrt[None, :]


# TODO(synk): VonMisesFisher.rsample uses data-dependent rejection sampling
# (acceptance while-loop) with no clean Pallas equivalent; implemented in
# plain JAX below (Wood's algorithm + Householder rotation).
def vmf_rsample(key, mu, kappa):
    n, m = mu.shape
    k = kappa  # [n, 1]
    sqrt_term = jnp.sqrt(4.0 * k * k + (m - 1) ** 2)
    b = (-2.0 * k + sqrt_term) / (m - 1)
    a = (m - 1 + 2.0 * k + sqrt_term) / 4.0
    d = 4.0 * a * b / (1.0 + b) - (m - 1) * jnp.log(float(m - 1))

    key_w, key_v = jax.random.split(key)

    def cond_fn(state):
        _, done, _ = state
        return jnp.logical_not(jnp.all(done))

    def body_fn(state):
        w, done, loop_key = state
        loop_key, kb, ku = jax.random.split(loop_key, 3)
        eps = jax.random.beta(kb, (m - 1) / 2.0, (m - 1) / 2.0, shape=(n, 1))
        u = jax.random.uniform(ku, (n, 1), minval=1e-6, maxval=1.0 - 1e-6)
        w_prop = (1.0 - (1.0 + b) * eps) / (1.0 - (1.0 - b) * eps)
        t = 2.0 * a * b / (1.0 - (1.0 - b) * eps)
        accept = ((m - 1) * jnp.log(t) - t + d) >= jnp.log(u)
        w_new = jnp.where(accept & jnp.logical_not(done), w_prop, w)
        return (w_new, done | accept, loop_key)

    w0 = jnp.zeros((n, 1), jnp.float32)
    done0 = jnp.zeros((n, 1), dtype=bool)
    w, _, _ = jax.lax.while_loop(cond_fn, body_fn, (w0, done0, key_w))

    v = jax.random.normal(key_v, (n, m - 1), jnp.float32)
    v = v / jnp.linalg.norm(v, axis=1, keepdims=True)
    z_tangent = jnp.sqrt(jnp.clip(1.0 - w * w, 0.0, None)) * v
    z_prime = jnp.concatenate([w, z_tangent], axis=1)

    # Householder rotation mapping e1 -> mu
    e1 = jnp.zeros((1, m), jnp.float32).at[0, 0].set(1.0)
    u_h = e1 - mu
    u_h = u_h / (jnp.linalg.norm(u_h, axis=1, keepdims=True) + 1e-8)
    z = z_prime - 2.0 * jnp.sum(z_prime * u_h, axis=1, keepdims=True) * u_h
    return z


# ---------------------------------- main ------------------------------------ #

if __name__ == "__main__":
    N = 256           # number of graph nodes
    C_IN = 4          # input_channels
    C_HID = 32        # hidden_channels
    C_OUT = 16        # output_channels
    R = 10.0          # self.r
    P_DROP = 0.1

    key = jax.random.PRNGKey(0)
    kx, kw1, kwmu, kwk, kdrop, kz = jax.random.split(key, 6)

    # node features
    x = jax.random.normal(kx, (N, C_IN), dtype=jnp.float32)

    # undirected ring graph edge_index [2, 2N] (no self-loops)
    src = jnp.arange(N)
    dst = (src + 1) % N
    edge_index = jnp.stack([jnp.concatenate([src, dst]),
                            jnp.concatenate([dst, src])])
    a_hat = gcn_norm_dense(edge_index, N)

    # deterministic parameter init (GCNConv weights [in, out] + bias)
    params = {
        "w1":  0.1 * jax.random.normal(kw1,  (C_IN,  C_HID), jnp.float32),
        "b1":  jnp.zeros((1, C_HID), jnp.float32),
        "wmu": 0.1 * jax.random.normal(kwmu, (C_HID, C_OUT), jnp.float32),
        "bmu": jnp.zeros((1, C_OUT), jnp.float32),
        "wk":  0.1 * jax.random.normal(kwk,  (C_HID, 1), jnp.float32),
        "bk":  jnp.zeros((1, 1), jnp.float32),
    }

    mu, kappa = encoder_forward_pallas(kdrop, x, a_hat, params,
                                       r=R, dropout_p=P_DROP)
    z = vmf_rsample(kz, mu, kappa)
    jax.block_until_ready((z, mu, kappa))

    # f32 reference with the same dropout mask; loose tolerance covers bf16 MXU
    keep = jax.random.bernoulli(kdrop, 1.0 - P_DROP, x.shape).astype(jnp.float32)
    x_d = x * keep / (1.0 - P_DROP)
    h_ref = jnp.maximum(a_hat @ (x_d @ params["w1"]) + params["b1"], 0.0)
    mu_ref = a_hat @ (h_ref @ params["wmu"]) + params["bmu"]
    mu_ref = mu_ref / jnp.linalg.norm(mu_ref, axis=1, keepdims=True)
    k_ref = jax.nn.softplus(a_hat @ (h_ref @ params["wk"]) + params["bk"]) + R

    assert z.shape == (N, C_OUT) and mu.shape == (N, C_OUT) and kappa.shape == (N, 1)
    assert bool(jnp.allclose(mu, mu_ref, atol=5e-2, rtol=5e-2))
    assert bool(jnp.allclose(kappa, k_ref, atol=5e-2, rtol=5e-2))
    print("KERNEL_OK")
</pallas_src>

<mosaic_0001>
module attributes {stable_mosaic.version = 11 : i64} {
  func.func @fused_kernel(%arg0: memref<256x128xbf16, #tpu.memory_space<vmem>>, %arg1: memref<256x256xbf16, #tpu.memory_space<vmem>>, %arg2: memref<1x128xf32, #tpu.memory_space<vmem>>, %arg3: memref<128x128xbf16, #tpu.memory_space<vmem>>, %arg4: memref<1x128xf32, #tpu.memory_space<vmem>>, %arg5: memref<256x128xf32, #tpu.memory_space<vmem>>) attributes {dimension_semantics = [], scalar_prefetch = 0 : i64, scratch_operands = 0 : i64, tpu.core_type = #tpu.core_type<tc>} {
    %c0 = arith.constant 0 : index
    %c0_0 = arith.constant 0 : index
    %0 = vector.load %arg1[%c0, %c0_0] : memref<256x256xbf16, #tpu.memory_space<vmem>>, vector<256x256xbf16>
    %c0_1 = arith.constant 0 : index
    %c0_2 = arith.constant 0 : index
    %1 = vector.load %arg0[%c0_1, %c0_2] : memref<256x128xbf16, #tpu.memory_space<vmem>>, vector<256x128xbf16>
    %cst = arith.constant dense<0.000000e+00> : vector<256x128xf32>
    %2 = tpu.matmul %0, %1, %cst {dimension_numbers = #tpu.dot_dimension_numbers<[1], [0], [0], [1], [0, 0, 1, 1], [], []>} : vector<256x256xbf16>, vector<256x128xbf16>, vector<256x128xf32> -> vector<256x128xf32>
    %c0_3 = arith.constant 0 : index
    %c0_4 = arith.constant 0 : index
    %3 = vector.load %arg2[%c0_3, %c0_4] : memref<1x128xf32, #tpu.memory_space<vmem>>, vector<1x128xf32>
    %4 = vector.broadcast %3 : vector<1x128xf32> to vector<256x128xf32>
    %5 = arith.addf %2, %4 : vector<256x128xf32>
    %cst_5 = arith.constant 0.000000e+00 : f32
    %6 = vector.broadcast %cst_5 : f32 to vector<256x128xf32>
    %7 = arith.maximumf %5, %6 : vector<256x128xf32>
    %8 = arith.truncf %7 : vector<256x128xf32> to vector<256x128xbf16>
    %c0_6 = arith.constant 0 : index
    %c0_7 = arith.constant 0 : index
    %9 = vector.load %arg3[%c0_6, %c0_7] : memref<128x128xbf16, #tpu.memory_space<vmem>>, vector<128x128xbf16>
    %cst_8 = arith.constant dense<0.000000e+00> : vector<256x128xf32>
    %10 = tpu.matmul %8, %9, %cst_8 {dimension_numbers = #tpu.dot_dimension_numbers<[1], [0], [0], [1], [0, 0, 1, 1], [], []>} : vector<256x128xbf16>, vector<128x128xbf16>, vector<256x128xf32> -> vector<256x128xf32>
    %11 = arith.truncf %10 : vector<256x128xf32> to vector<256x128xbf16>
    %cst_9 = arith.constant dense<0.000000e+00> : vector<256x128xf32>
    %12 = tpu.matmul %0, %11, %cst_9 {dimension_numbers = #tpu.dot_dimension_numbers<[1], [0], [0], [1], [0, 0, 1, 1], [], []>} : vector<256x256xbf16>, vector<256x128xbf16>, vector<256x128xf32> -> vector<256x128xf32>
    %c0_10 = arith.constant 0 : index
    %c0_11 = arith.constant 0 : index
    %13 = vector.load %arg4[%c0_10, %c0_11] : memref<1x128xf32, #tpu.memory_space<vmem>>, vector<1x128xf32>
    %14 = vector.broadcast %13 : vector<1x128xf32> to vector<256x128xf32>
    %15 = arith.addf %12, %14 : vector<256x128xf32>
    %16 = tpu.iota {dimensions = array<i32: 1>} : vector<256x128xi32>
    %c16_i32 = arith.constant 16 : i32
    %17 = vector.broadcast %c16_i32 : i32 to vector<256x128xi32>
    %18 = arith.cmpi slt, %16, %17 : vector<256x128xi32>
    %c16_i32_12 = arith.constant 16 : i32
    %19 = vector.broadcast %c16_i32_12 : i32 to vector<256x128xi32>
    %20 = arith.cmpi eq, %16, %19 : vector<256x128xi32>
    %21 = arith.mulf %15, %15 : vector<256x128xf32>
    %cst_13 = arith.constant 0.000000e+00 : f32
    %22 = vector.broadcast %cst_13 : f32 to vector<256x128xf32>
    %23 = arith.select %18, %21, %22 : vector<256x128xi1>, vector<256x128xf32>
    %cst_14 = arith.constant dense<0.000000e+00> : vector<256xf32>
    %24 = vector.multi_reduction <add>, %23, %cst_14 [1] : vector<256x128xf32> to vector<256xf32>
    %25 = vector.shape_cast %24 : vector<256xf32> to vector<256x1xf32>
    %26 = math.rsqrt %25 : vector<256x1xf32>
    %27 = vector.broadcast %26 : vector<256x1xf32> to vector<256x128xf32>
    %28 = arith.mulf %15, %27 : vector<256x128xf32>
    %cst_15 = arith.constant 0.000000e+00 : f32
    %29 = vector.broadcast %cst_15 : f32 to vector<256x128xf32>
    %30 = arith.maximumf %15, %29 : vector<256x128xf32>
    %31 = math.absf %15 : vector<256x128xf32>
    %cst_16 = arith.constant 0.000000e+00 : f32
    %32 = vector.broadcast %cst_16 : f32 to vector<256x128xf32>
    %33 = arith.subf %32, %31 : vector<256x128xf32>
    %34 = math.exp %33 : vector<256x128xf32>
    %35 = math.log1p %34 : vector<256x128xf32>
    %36 = arith.addf %30, %35 : vector<256x128xf32>
    %cst_17 = arith.constant 1.000000e+01 : f32
    %37 = vector.broadcast %cst_17 : f32 to vector<256x128xf32>
    %38 = arith.addf %36, %37 : vector<256x128xf32>
    %cst_18 = arith.constant 0.000000e+00 : f32
    %39 = vector.broadcast %cst_18 : f32 to vector<256x128xf32>
    %40 = arith.select %20, %38, %39 : vector<256x128xi1>, vector<256x128xf32>
    %41 = arith.select %18, %28, %40 : vector<256x128xi1>, vector<256x128xf32>
    %c0_19 = arith.constant 0 : index
    %c0_20 = arith.constant 0 : index
    %42 = vector.load %arg5[%c0_19, %c0_20] : memref<256x128xf32, #tpu.memory_space<vmem>>, vector<256x128xf32>
    tpu.vector_store %arg5[%c0_19, %c0_20], %41 {strides = array<i32>} : memref<256x128xf32, #tpu.memory_space<vmem>>, vector<256x128xf32>,
    return
  }
}

</mosaic_0001>

<bundles_post_ra>
// kernel: tpu_custom_call.1
= control target key start
LH: loop header
LB: loop body
LE: loop exit
PB: predicated region body
PF: predicated region fallthrough
CT: control target
= control target key end

     0   :  { %10 = vsyncpa [#allocation3], 0  ;;  %s3610_s0 = inlined_call_operand.hbm [shape: bf16[256,128], index: 0, kind: input, shape index: {}]   ;;  %s3611_s1 = inlined_call_operand.hbm [shape: bf16[256,256], index: 1, kind: input, shape index: {}]   ;;  %s3612_s2 = inlined_call_operand.vmem [shape: f32[1,128], index: 2, kind: input, shape index: {}]   ;;  %s3613_s3 = inlined_call_operand.hbm [shape: bf16[128,128], index: 3, kind: input, shape index: {}]   ;;  %s3614_s4 = inlined_call_operand.vmem [shape: f32[1,128], index: 4, kind: input, shape index: {}]   ;;  %s3615_s5 = inlined_call_operand.hbm [shape: f32[256,128], index: 5, kind: output, shape index: {}]  }
   0x1   :  { %11 = vsyncpa [#allocation6], 0 }
   0x2   :  { %12 = vsyncpa [#allocation4], 0  ;;  %s2558_s18 = smov [#allocation5]  }
   0x3   :  { %s30_s19 = sshll.u32 %s2558_s18, 4  ;;  %s31_s19 = int_to_ptr.vmem [resolvable:$true] %s30_s19 }
   0x4   :  { %s2480_s20 = scalar_lea.vmem %s31_s19, 4096  ;;  %p2485_p1 = scmp.lt.s32.totalorder %s31_s19, %s31_s19 }
   0x5   :  { %p2481_p0 = scmp.ne.s32.totalorder %s31_s19, %s2480_s20  ;;  %p2486_p2 = scmp.lt.s32.totalorder %s2480_s20, %s2480_s20 }
   0x7   :  { %p2487_p3 = por %p2486_p2, %p2485_p1 }
   0x9   :  { %p2488_p4 = pnand %p2487_p3, %p2481_p0 }
   0xb   :  { %2491 = shalt.err (!%p2488_p4)
}
   0xc   :  { %s2559_s21 = smov 128   ;;  %s2560_s22 = smov 8  }
   0xd   :  { %36 = dma.hbm_to_vmem [thread:$0]  %s3611_s1, 4096, %s31_s19, [#allocation6], %s2559_s21, %s2559_s21, %s2560_s22  }
   0xe   :  { %s2561_s25 = smov [#allocation2]  }
   0xf   :  { %s18_s26 = sshll.u32 %s2561_s25, 4  ;;  %s19_s26 = int_to_ptr.vmem [resolvable:$true] %s18_s26 }
  0x10   :  { %s2500_s27 = scalar_lea.vmem %s19_s26, 2048  ;;  %p2505_p6 = scmp.lt.s32.totalorder %s19_s26, %s19_s26 }
  0x11   :  { %p2501_p5 = scmp.ne.s32.totalorder %s19_s26, %s2500_s27  ;;  %p2506_p7 = scmp.lt.s32.totalorder %s2500_s27, %s2500_s27 }
  0x13   :  { %p2507_p8 = por %p2506_p7, %p2505_p6 }
  0x15   :  { %p2508_p9 = pnand %p2507_p8, %p2501_p5 }
  0x17   :  { %2511 = shalt.err (!%p2508_p9)
}
  0x18   :  { %s2562_s28 = smov 64   ;;  %s2563_s29 = smov 4  }
  0x19   :  { %24 = dma.hbm_to_vmem [thread:$0]  %s3610_s0, 2048, %s19_s26, [#allocation3], %s2562_s28, %s2562_s28, %s2563_s29  }
  0x1a   :  { %s2564_s7 = smov [#allocation7]  }
  0x1b   :  { %s44_s8 = sshll.u32 %s2564_s7, 4  ;;  %s45_s8 = int_to_ptr.vmem [resolvable:$true] %s44_s8 }
  0x1c   :  { %s2520_s1 = scalar_lea.vmem %s45_s8, 1024  ;;  %p2525_p11 = scmp.lt.s32.totalorder %s45_s8, %s45_s8 }
  0x1d   :  { %p2521_p10 = scmp.ne.s32.totalorder %s45_s8, %s2520_s1  ;;  %p2526_p12 = scmp.lt.s32.totalorder %s2520_s1, %s2520_s1 }
  0x1f   :  { %p2527_p13 = por %p2526_p12, %p2525_p11 }
  0x21   :  { %p2528_p0 = pnand %p2527_p13, %p2521_p10 }
  0x23   :  { %2531 = shalt.err (!%p2528_p0)
}
  0x24   :  { %50 = dma.hbm_to_vmem [thread:$0]  %s3613_s3, 1024, %s45_s8, [#allocation6], %s2562_s28, %s2562_s28, %s2563_s29  }
  0x25   :  { %2552 = dma.done.wait [#allocation3], 2048  }
  0x26   :  { %2553 = vsyncadd [#allocation3], 4294965248 }
  0x27   :  { %2554 = dma.done.wait [#allocation6], 5120  }
  0x28   :  { %2555 = vsyncadd [#allocation6], 4294962176  ;;  %v2208_v0 = vld [vmem:[#allocation2 + $0x78] sm:$0xff]   ;;  %v2210_v2 = vld [vmem:[#allocation2 + $0x70] sm:$0xff]  }
  0x29   :  { %v2209_v1 = vld [vmem:[#allocation2 + $0x38] sm:$0xff]   ;;  %1888 = vmatprep.subr.bf16.mxu0 %v2208_v0  ;;  %v2211_v3 = vld [vmem:[#allocation2 + $0x30] sm:$0xff]   ;;  %v2212_v4 = vld [vmem:[#allocation2 + $0x68] sm:$0xff]  }
  0x2a   :  { %1889 = vmatpush3.bf16.msra.mxu0 %v2209_v1  ;;  %v2213_v5 = vld [vmem:[#allocation2 + $0x28] sm:$0xff]   ;;  %v2214_v6 = vld [vmem:[#allocation2 + $0x60] sm:$0xff]   ;;  %v2216_v8 = vld [vmem:[#allocation2 + $0x58] sm:$0xff]  }
  0x2b   :  { %1890 = vmatprep.subr.bf16.mxu0 %v2210_v2  ;;  %v2215_v7 = vld [vmem:[#allocation2 + $0x20] sm:$0xff]   ;;  %v2217_v9 = vld [vmem:[#allocation2 + $0x18] sm:$0xff]   ;;  %v2218_v10 = vld [vmem:[#allocation2 + $0x50] sm:$0xff]  }
  0x2c   :  { %v2608_v11 = vld [vmem:[#allocation5 + $0x4] ss:$8 sps:$4 sm:$0xff]   ;;  %v2219_v12 = vld [vmem:[#allocation2 + $0x10] sm:$0xff]   ;;  %v2611_v17 = vld [vmem:[#allocation5] ss:$8 sps:$4 sm:$0xff]  }
  0x2d   :  { %422 = vmatprep.mubr.bf16.mxu0 %v2608_v11  ;;  %v2220_v13 = vld [vmem:[#allocation2 + $0x48] sm:$0xff]   ;;  %v2222_v15 = vld [vmem:[#allocation2 + $0x40] sm:$0xff]   ;;  %v2613_v18 = vld [vmem:[#allocation5 + $0x14] ss:$8 sps:$4 sm:$0xff]  }
  0x2e   :  { %1891 = vmatpush3.bf16.msra.mxu0 %v2211_v3  ;;  %v2221_v14 = vld [vmem:[#allocation2 + $0x8] sm:$0xff]   ;;  %v2223_v16 = vld [vmem:[#allocation2] sm:$0xff]   ;;  %v2617_v19 = vld [vmem:[#allocation5 + $0x10] ss:$8 sps:$4 sm:$0xff]  }
  0x2f   :  { %1892 = vmatprep.subr.bf16.mxu0 %v2212_v4  ;;  %v2619_v20 = vld [vmem:[#allocation5 + $0x24] ss:$8 sps:$4 sm:$0xff]   ;;  %v2272_v21 = vld [vmem:[#allocation7 + $0x38] sm:$0xff]   ;;  %v2273_v22 = vld [vmem:[#allocation7 + $0x30] sm:$0xff]  }
  0x30   :  { %v2274_v23 = vld [vmem:[#allocation7 + $0x28] sm:$0xff]   ;;  %2184 = vmatprep.subr.bf16.mxu1 %v2272_v21  ;;  %v2625_v25 = vld [vmem:[#allocation5 + $0x34] ss:$8 sps:$4 sm:$0xff]   ;;  %v2629_v26 = vld [vmem:[#allocation5 + $0x30] ss:$8 sps:$4 sm:$0xff]  }
  0x31   :  { %2192 = vmatpush3.bf16.msra.mxu1 %v2272_v21  ;;  %v2623_v24 = vld [vmem:[#allocation5 + $0x20] ss:$8 sps:$4 sm:$0xff]   ;;  %v2631_v27 = vld [vmem:[#allocation5 + $0x44] ss:$8 sps:$4 sm:$0xff]   ;;  %v2637_v29 = vld [vmem:[#allocation5 + $0x54] ss:$8 sps:$4 sm:$0xff]  }
  0x32   :  { %1893 = vmatpush3.bf16.msra.mxu0 %v2213_v5  ;;  %2185 = vmatprep.subr.bf16.mxu1 %v2273_v22  ;;  %v2635_v28 = vld [vmem:[#allocation5 + $0x40] ss:$8 sps:$4 sm:$0xff]   ;;  %v2641_v30 = vld [vmem:[#allocation5 + $0x50] ss:$8 sps:$4 sm:$0xff]   ;;  %v2643_v31 = vld [vmem:[#allocation5 + $0x64] ss:$8 sps:$4 sm:$0xff]  }
  0x33   :  { %1894 = vmatprep.subr.bf16.mxu0 %v2214_v6  ;;  %v2647_v32 = vld [vmem:[#allocation5 + $0x60] ss:$8 sps:$4 sm:$0xff]   ;;  %v2649_v33 = vld [vmem:[#allocation5 + $0x74] ss:$8 sps:$4 sm:$0xff]   ;;  %v2653_v34 = vld [vmem:[#allocation5 + $0x70] ss:$8 sps:$4 sm:$0xff]  }
  0x34   :  { %v2655_v35 = vld [vmem:[#allocation5 + $0x84] ss:$8 sps:$4 sm:$0xff]   ;;  %v2659_v36 = vld [vmem:[#allocation5 + $0x80] ss:$8 sps:$4 sm:$0xff]   ;;  %v2661_v37 = vld [vmem:[#allocation5 + $0x94] ss:$8 sps:$4 sm:$0xff]  }
  0x35   :  { %2193 = vmatpush3.bf16.msra.mxu1 %v2273_v22  ;;  %v2275_v38 = vld [vmem:[#allocation7 + $0x20] sm:$0xff]   ;;  %v2665_v39 = vld [vmem:[#allocation5 + $0x90] ss:$8 sps:$4 sm:$0xff]   ;;  %v2673_v44 = vld [vmem:[#allocation5 + $0xb4] ss:$8 sps:$4 sm:$0xff]  }
  0x36   :  { %1895 = vmatpush3.bf16.msra.mxu0 %v2215_v7  ;;  %2186 = vmatprep.subr.bf16.mxu1 %v2274_v23  ;;  %v2667_v40 = vld [vmem:[#allocation5 + $0xa4] ss:$8 sps:$4 sm:$0xff]   ;;  %v2276_v41 = vld [vmem:[#allocation7 + $0x18] sm:$0xff]   ;;  %v2277_v42 = vld [vmem:[#allocation7 + $0x10] sm:$0xff]  }
  0x37   :  { %1896 = vmatprep.subr.bf16.mxu0 %v2216_v8  ;;  %v2671_v43 = vld [vmem:[#allocation5 + $0xa0] ss:$8 sps:$4 sm:$0xff]   ;;  %v2677_v47 = vld [vmem:[#allocation5 + $0xb0] ss:$8 sps:$4 sm:$0xff]   ;;  %v2679_v48 = vld [vmem:[#allocation5 + $0xc4] ss:$8 sps:$4 sm:$0xff]  }
  0x38   :  { %v2278_v45 = vld [vmem:[#allocation7 + $0x8] sm:$0xff]   ;;  %v2279_v46 = vld [vmem:[#allocation7] sm:$0xff]   ;;  %3636 = vst [vmem:[#allocation12_spill] sm:$0xff] %v2679_v48  ;;  %v2685_v50 = vld [vmem:[#allocation5 + $0xd4] ss:$8 sps:$4 sm:$0xff]  }
  0x39   :  { %2194 = vmatpush3.bf16.msra.mxu1 %v2274_v23  ;;  %v2683_v49 = vld [vmem:[#allocation5 + $0xc0] ss:$8 sps:$4 sm:$0xff]   ;;  %3638 = vst [vmem:[#allocation14_spill] sm:$0xff] %v2685_v50  ;;  %v2689_v51 = vld [vmem:[#allocation5 + $0xd0] ss:$8 sps:$4 sm:$0xff]  }
  0x3a   :  { %1897 = vmatpush3.bf16.msra.mxu0 %v2217_v9  ;;  %2187 = vmatprep.subr.bf16.mxu1 %v2275_v38  ;;  %3637 = vst [vmem:[#allocation13_spill] sm:$0xff] %v2683_v49  ;;  %3639 = vst [vmem:[#allocation15_spill] sm:$0xff] %v2689_v51  ;;  %v2691_v52 = vld [vmem:[#allocation5 + $0xe4] ss:$8 sps:$4 sm:$0xff]   ;;  %v2695_v53 = vld [vmem:[#allocation5 + $0xe0] ss:$8 sps:$4 sm:$0xff]  }
  0x3b   :  { %1898 = vmatprep.subr.bf16.mxu0 %v2218_v10  ;;  %3640 = vst [vmem:[#allocation16_spill] sm:$0xff] %v2691_v52  ;;  %3641 = vst [vmem:[#allocation17_spill] sm:$0xff] %v2695_v53  ;;  %v2697_v54 = vld [vmem:[#allocation5 + $0xf4] ss:$8 sps:$4 sm:$0xff]   ;;  %v2701_v55 = vld [vmem:[#allocation5 + $0xf0] ss:$8 sps:$4 sm:$0xff]  }
  0x3c   :  { %3642 = vst [vmem:[#allocation18_spill] sm:$0xff] %v2697_v54  ;;  %3643 = vst [vmem:[#allocation19_spill] sm:$0xff] %v2701_v55  ;;  %v2707_v59 = vld [vmem:[%s3612_s2] ss:$0 sm:$0xff] }
  0x3d   :  { %2195 = vmatpush3.bf16.msra.mxu1 %v2275_v38 }
  0x3e   :  { %1899 = vmatpush3.bf16.msra.mxu0 %v2219_v12  ;;  %2188 = vmatprep.subr.bf16.mxu1 %v2276_v41 }
  0x3f   :  { %1900 = vmatprep.subr.bf16.mxu0 %v2220_v13 }
  0x41   :  { %2196 = vmatpush3.bf16.msra.mxu1 %v2276_v41 }
  0x42   :  { %1901 = vmatpush3.bf16.msra.mxu0 %v2221_v14  ;;  %2189 = vmatprep.subr.bf16.mxu1 %v2277_v42 }
  0x43   :  { %1902 = vmatprep.subr.bf16.mxu0 %v2222_v15 }
  0x45   :  { %2197 = vmatpush3.bf16.msra.mxu1 %v2277_v42 }
  0x46   :  { %1903 = vmatpush3.bf16.msra.mxu0 %v2223_v16  ;;  %2190 = vmatprep.subr.bf16.mxu1 %v2278_v45 }
  0x47   :  { %2136 = vmatprep.subr.bf16.mxu0 %v2272_v21 }
  0x49   :  { %423 = vmatmul.mubr.bf16.vlgmr.msra.gmra.mxu0 %v2611_v17  ;;  %2198 = vmatpush3.bf16.msra.mxu1 %v2278_v45 }
  0x4a   :  { %430 = vmatprep.mubr.bf16.mxu0 %v2613_v18  ;;  %2137 = vmatpush3.bf16.msra.mxu0 %v2272_v21 }
  0x4b   :  { %2138 = vmatprep.subr.bf16.mxu0 %v2273_v22  ;;  %2191 = vmatprep.subr.bf16.mxu1 %v2279_v46 }
  0x4d   :  { %2199 = vmatpush3.bf16.msra.mxu1 %v2279_v46 }
  0x4e   :  { %2139 = vmatpush3.bf16.msra.mxu0 %v2273_v22 }
  0x4f   :  { %2140 = vmatprep.subr.bf16.mxu0 %v2274_v23 }
  0x51   :  { %431 = vmatmul.mubr.bf16.gmra.mxu0 %v2617_v19 }
  0x52   :  { %438 = vmatprep.mubr.bf16.mxu0 %v2619_v20  ;;  %2141 = vmatpush3.bf16.msra.mxu0 %v2274_v23 }
  0x53   :  { %2142 = vmatprep.subr.bf16.mxu0 %v2275_v38 }
  0x56   :  { %2143 = vmatpush3.bf16.msra.mxu0 %v2275_v38 }
  0x57   :  { %2144 = vmatprep.subr.bf16.mxu0 %v2276_v41 }
  0x59   :  { %439 = vmatmul.mubr.bf16.gmra.mxu0 %v2623_v24 }
  0x5a   :  { %446 = vmatprep.mubr.bf16.mxu0 %v2625_v25  ;;  %2145 = vmatpush3.bf16.msra.mxu0 %v2276_v41 }
  0x5b   :  { %2146 = vmatprep.subr.bf16.mxu0 %v2277_v42 }
  0x5e   :  { %2147 = vmatpush3.bf16.msra.mxu0 %v2277_v42 }
  0x5f   :  { %2148 = vmatprep.subr.bf16.mxu0 %v2278_v45 }
  0x61   :  { %447 = vmatmul.mubr.bf16.gmra.mxu0 %v2629_v26 }
  0x62   :  { %454 = vmatprep.mubr.bf16.mxu0 %v2631_v27  ;;  %2149 = vmatpush3.bf16.msra.mxu0 %v2278_v45 }
  0x63   :  { %2150 = vmatprep.subr.bf16.mxu0 %v2279_v46 }
  0x66   :  { %2151 = vmatpush3.bf16.msra.mxu0 %v2279_v46 }
  0x69   :  { %455 = vmatmul.mubr.bf16.gmra.mxu0 %v2635_v28 }
  0x6a   :  { %462 = vmatprep.mubr.bf16.mxu0 %v2637_v29 }
  0x71   :  { %463 = vmatmul.mubr.bf16.gmra.mxu0 %v2641_v30 }
  0x72   :  { %470 = vmatprep.mubr.bf16.mxu0 %v2643_v31 }
  0x79   :  { %471 = vmatmul.mubr.bf16.gmra.mxu0 %v2647_v32 }
  0x7a   :  { %478 = vmatprep.mubr.bf16.mxu0 %v2649_v33 }
  0x81   :  { %479 = vmatmul.mubr.bf16.gmra.mxu0 %v2653_v34 }
  0x82   :  { %486 = vmatprep.mubr.bf16.mxu0 %v2655_v35 }
  0x89   :  { %487 = vmatmul.mubr.bf16.gmra.mxu0 %v2659_v36 }
  0x8a   :  { %494 = vmatprep.mubr.bf16.mxu0 %v2661_v37 }
  0x91   :  { %495 = vmatmul.mubr.bf16.gmra.mxu0 %v2665_v39 }
  0x92   :  { %502 = vmatprep.mubr.bf16.mxu0 %v2667_v40 }
  0x99   :  { %503 = vmatmul.mubr.bf16.gmra.mxu0 %v2671_v43 }
  0x9a   :  { %510 = vmatprep.mubr.bf16.mxu0 %v2673_v44 }
  0xa1   :  { %511 = vmatmul.mubr.bf16.gmra.mxu0 %v2677_v47 }
  0xa2   :  { %518 = vmatprep.mubr.bf16.mxu0 %v2679_v48 }
  0xa9   :  { %519 = vmatmul.mubr.bf16.gmra.mxu0 %v2683_v49 }
  0xaa   :  { %526 = vmatprep.mubr.bf16.mxu0 %v2685_v50 }
  0xb1   :  { %527 = vmatmul.mubr.bf16.gmra.mxu0 %v2689_v51 }
  0xb2   :  { %534 = vmatprep.mubr.bf16.mxu0 %v2691_v52 }
  0xb9   :  { %535 = vmatmul.mubr.bf16.gmra.mxu0 %v2695_v53 }
  0xba   :  { %542 = vmatprep.mubr.bf16.mxu0 %v2697_v54 }
  0xc1   :  { %543 = vmatmul.mubr.bf16.gmra.mxu0 %v2701_v55 }
 0x109   :  { %v1904_v56 = vpop.f32.mrf.mxu0 }
 0x10b   :  { %v1905_v57 = vpop.f32.mrf.mxu0 }
 0x10c   :  { %v1906_v58 = vadd.f32 %v1905_v57, %v1904_v56 }
 0x10d   :  { %v1907_v60 = vpop.f32.mrf.mxu0 }
 0x10e   :  { %v425_v62 = vadd.f32 %v1906_v58, %v2707_v59 }
 0x10f   :  { %v1908_v61 = vpop.f32.mrf.mxu0 }
 0x110   :  { %v1909_v63 = vadd.f32 %v1908_v61, %v1907_v60  ;;  %v551_v3 = vmax.f32 %v425_v62, 0.0 }
 0x111   :  { %v1910_v0 = vpop.f32.mrf.mxu0 }
 0x112   :  { %v428_v1 = vadd.f32 %v1909_v63, %v2707_v59 }
 0x113   :  { %v1911_v2 = vpop.f32.mrf.mxu0 }
 0x114   :  { %v552_v4 = vmax.f32 %v428_v1, 0.0  ;;  %v1912_v5 = vadd.f32 %v1911_v2, %v1910_v0 }
 0x115   :  { %v1913_v6 = vpop.f32.mrf.mxu0 }
 0x116   :  { %v583_v7 = vpack.c.bf16 %v552_v4, %v551_v3  ;;  %v433_v9 = vadd.f32 %v1912_v5, %v2707_v59 }
 0x117   :  { %v1914_v8 = vpop.f32.mrf.mxu0 }
 0x118   :  { %v1915_v10 = vadd.f32 %v1914_v8, %v1913_v6  ;;  %2152 = vmatprep.mubr.bf16.mxu0 %v583_v7  ;;  %v553_v15 = vmax.f32 %v433_v9, 0.0 }
 0x119   :  { %v1916_v12 = vpop.f32.mrf.mxu0 }
 0x11a   :  { %v436_v13 = vadd.f32 %v1915_v10, %v2707_v59 }
 0x11b   :  { %v1917_v14 = vpop.f32.mrf.mxu0 }
 0x11c   :  { %v554_v16 = vmax.f32 %v436_v13, 0.0  ;;  %v1918_v21 = vadd.f32 %v1917_v14, %v1916_v12 }
 0x11d   :  { %v1919_v22 = vpop.f32.mrf.mxu0 }
 0x11e   :  { %v584_v23 = vpack.c.bf16 %v554_v16, %v553_v15  ;;  %v441_v41 = vadd.f32 %v1918_v21, %v2707_v59 }
 0x11f   :  { %v1920_v38 = vpop.f32.mrf.mxu0 }
 0x120   :  { %v1921_v42 = vadd.f32 %v1920_v38, %v1919_v22  ;;  %2153 = vmatmul.mubr.bf16.vlgmr.msra.gmra.mxu0 %v584_v23  ;;  %v555_v57 = vmax.f32 %v441_v41, 0.0 }
 0x121   :  { %v1922_v45 = vpop.f32.mrf.mxu0 }
 0x122   :  { %v444_v46 = vadd.f32 %v1921_v42, %v2707_v59 }
 0x123   :  { %v1923_v56 = vpop.f32.mrf.mxu0 }
 0x124   :  { %v556_v58 = vmax.f32 %v444_v46, 0.0  ;;  %v1924_v60 = vadd.f32 %v1923_v56, %v1922_v45 }
 0x125   :  { %v1925_v61 = vpop.f32.mrf.mxu0 }
 0x126   :  { %v585_v62 = vpack.c.bf16 %v556_v58, %v555_v57  ;;  %v449_v0 = vadd.f32 %v1924_v60, %v2707_v59 }
 0x127   :  { %v1926_v63 = vpop.f32.mrf.mxu0 }
 0x128   :  { %v1927_v1 = vadd.f32 %v1926_v63, %v1925_v61  ;;  %2156 = vmatprep.mubr.bf16.mxu0 %v585_v62  ;;  %v557_v5 = vmax.f32 %v449_v0, 0.0 }
 0x129   :  { %v1928_v2 = vpop.f32.mrf.mxu0 }
 0x12a   :  { %v452_v3 = vadd.f32 %v1927_v1, %v2707_v59 }
 0x12b   :  { %v1929_v4 = vpop.f32.mrf.mxu0 }
 0x12c   :  { %v558_v6 = vmax.f32 %v452_v3, 0.0  ;;  %v1930_v7 = vadd.f32 %v1929_v4, %v1928_v2 }
 0x12d   :  { %v1931_v8 = vpop.f32.mrf.mxu0 }
 0x12e   :  { %v586_v9 = vpack.c.bf16 %v558_v6, %v557_v5  ;;  %v457_v12 = vadd.f32 %v1930_v7, %v2707_v59 }
 0x12f   :  { %v1932_v10 = vpop.f32.mrf.mxu0 }
 0x130   :  { %v1933_v13 = vadd.f32 %v1932_v10, %v1931_v8  ;;  %2157 = vmatmul.mubr.bf16.gmra.mxu0 %v586_v9  ;;  %v559_v21 = vmax.f32 %v457_v12, 0.0 }
 0x131   :  { %v1934_v14 = vpop.f32.mrf.mxu0 }
 0x132   :  { %v460_v15 = vadd.f32 %v1933_v13, %v2707_v59 }
 0x133   :  { %v1935_v16 = vpop.f32.mrf.mxu0 }
 0x134   :  { %v560_v22 = vmax.f32 %v460_v15, 0.0  ;;  %v1936_v23 = vadd.f32 %v1935_v16, %v1934_v14 }
 0x135   :  { %v1937_v38 = vpop.f32.mrf.mxu0 }
 0x136   :  { %v587_v41 = vpack.c.bf16 %v560_v22, %v559_v21  ;;  %v465_v45 = vadd.f32 %v1936_v23, %v2707_v59 }
 0x137   :  { %v1938_v42 = vpop.f32.mrf.mxu0 }
 0x138   :  { %v1939_v46 = vadd.f32 %v1938_v42, %v1937_v38  ;;  %2160 = vmatprep.mubr.bf16.mxu0 %v587_v41  ;;  %v561_v60 = vmax.f32 %v465_v45, 0.0 }
 0x139   :  { %v1940_v56 = vpop.f32.mrf.mxu0 }
 0x13a   :  { %v468_v57 = vadd.f32 %v1939_v46, %v2707_v59 }
 0x13b   :  { %v1941_v58 = vpop.f32.mrf.mxu0 }
 0x13c   :  { %v562_v61 = vmax.f32 %v468_v57, 0.0  ;;  %v1942_v62 = vadd.f32 %v1941_v58, %v1940_v56 }
 0x13d   :  { %v1943_v63 = vpop.f32.mrf.mxu0 }
 0x13e   :  { %v588_v0 = vpack.c.bf16 %v562_v61, %v561_v60  ;;  %v473_v2 = vadd.f32 %v1942_v62, %v2707_v59 }
 0x13f   :  { %v1944_v1 = vpop.f32.mrf.mxu0 }
 0x140   :  { %v1945_v3 = vadd.f32 %v1944_v1, %v1943_v63  ;;  %2161 = vmatmul.mubr.bf16.gmra.mxu0 %v588_v0  ;;  %v563_v7 = vmax.f32 %v473_v2, 0.0 }
 0x141   :  { %v1946_v4 = vpop.f32.mrf.mxu0 }
 0x142   :  { %v476_v5 = vadd.f32 %v1945_v3, %v2707_v59 }
 0x143   :  { %v1947_v6 = vpop.f32.mrf.mxu0 }
 0x144   :  { %v564_v8 = vmax.f32 %v476_v5, 0.0  ;;  %v1948_v9 = vadd.f32 %v1947_v6, %v1946_v4 }
 0x145   :  { %v1949_v10 = vpop.f32.mrf.mxu0 }
 0x146   :  { %v589_v12 = vpack.c.bf16 %v564_v8, %v563_v7  ;;  %v481_v14 = vadd.f32 %v1948_v9, %v2707_v59 }
 0x147   :  { %v1950_v13 = vpop.f32.mrf.mxu0 }
 0x148   :  { %v1951_v15 = vadd.f32 %v1950_v13, %v1949_v10  ;;  %2164 = vmatprep.mubr.bf16.mxu0 %v589_v12  ;;  %v565_v23 = vmax.f32 %v481_v14, 0.0 }
 0x149   :  { %v1952_v16 = vpop.f32.mrf.mxu0 }
 0x14a   :  { %v484_v21 = vadd.f32 %v1951_v15, %v2707_v59 }
 0x14b   :  { %v1953_v22 = vpop.f32.mrf.mxu0 }
 0x14c   :  { %v566_v38 = vmax.f32 %v484_v21, 0.0  ;;  %v1954_v41 = vadd.f32 %v1953_v22, %v1952_v16 }
 0x14d   :  { %v1955_v42 = vpop.f32.mrf.mxu0 }
 0x14e   :  { %v590_v45 = vpack.c.bf16 %v566_v38, %v565_v23  ;;  %v489_v57 = vadd.f32 %v1954_v41, %v2707_v59 }
 0x14f   :  { %v1956_v46 = vpop.f32.mrf.mxu0 }
 0x150   :  { %v1957_v56 = vadd.f32 %v1956_v46, %v1955_v42  ;;  %2165 = vmatmul.mubr.bf16.gmra.mxu0 %v590_v45  ;;  %v567_v63 = vmax.f32 %v489_v57, 0.0 }
 0x151   :  { %v1958_v58 = vpop.f32.mrf.mxu0 }
 0x152   :  { %v492_v60 = vadd.f32 %v1957_v56, %v2707_v59 }
 0x153   :  { %v1959_v61 = vpop.f32.mrf.mxu0 }
 0x154   :  { %v1960_v62 = vadd.f32 %v1959_v61, %v1958_v58  ;;  %v568_v0 = vmax.f32 %v492_v60, 0.0 }
 0x155   :  { %v1961_v1 = vpop.f32.mrf.mxu0 }
 0x156   :  { %v591_v2 = vpack.c.bf16 %v568_v0, %v567_v63  ;;  %v497_v4 = vadd.f32 %v1960_v62, %v2707_v59 }
 0x157   :  { %v1962_v3 = vpop.f32.mrf.mxu0 }
 0x158   :  { %v1963_v5 = vadd.f32 %v1962_v3, %v1961_v1  ;;  %2168 = vmatprep.mubr.bf16.mxu1 %v591_v2  ;;  %v569_v9 = vmax.f32 %v497_v4, 0.0 }
 0x159   :  { %v1964_v6 = vpop.f32.mrf.mxu0 }
 0x15a   :  { %v500_v7 = vadd.f32 %v1963_v5, %v2707_v59 }
 0x15b   :  { %v1965_v8 = vpop.f32.mrf.mxu0 }
 0x15c   :  { %v570_v10 = vmax.f32 %v500_v7, 0.0  ;;  %v1966_v12 = vadd.f32 %v1965_v8, %v1964_v6 }
 0x15d   :  { %v1967_v13 = vpop.f32.mrf.mxu0 }
 0x15e   :  { %v592_v14 = vpack.c.bf16 %v570_v10, %v569_v9  ;;  %v505_v16 = vadd.f32 %v1966_v12, %v2707_v59 }
 0x15f   :  { %v1968_v15 = vpop.f32.mrf.mxu0 }
 0x160   :  { %v1969_v21 = vadd.f32 %v1968_v15, %v1967_v13  ;;  %2169 = vmatmul.mubr.bf16.vlgmr.msra.gmra.mxu1 %v592_v14  ;;  %v571_v41 = vmax.f32 %v505_v16, 0.0 }
 0x161   :  { %v1970_v22 = vpop.f32.mrf.mxu0 }
 0x162   :  { %v508_v23 = vadd.f32 %v1969_v21, %v2707_v59 }
 0x163   :  { %v1971_v38 = vpop.f32.mrf.mxu0 }
 0x164   :  { %v572_v42 = vmax.f32 %v508_v23, 0.0  ;;  %v1972_v45 = vadd.f32 %v1971_v38, %v1970_v22 }
 0x165   :  { %v1973_v46 = vpop.f32.mrf.mxu0 }
 0x166   :  { %v593_v56 = vpack.c.bf16 %v572_v42, %v571_v41  ;;  %v513_v58 = vadd.f32 %v1972_v45, %v2707_v59 }
 0x167   :  { %v1974_v57 = vpop.f32.mrf.mxu0 }
 0x168   :  { %v1975_v60 = vadd.f32 %v1974_v57, %v1973_v46  ;;  %2172 = vmatprep.mubr.bf16.mxu1 %v593_v56  ;;  %v573_v0 = vmax.f32 %v513_v58, 0.0 }
 0x169   :  { %v1976_v61 = vpop.f32.mrf.mxu0 }
 0x16a   :  { %v516_v62 = vadd.f32 %v1975_v60, %v2707_v59 }
 0x16b   :  { %v1977_v63 = vpop.f32.mrf.mxu0 }
 0x16c   :  { %v574_v1 = vmax.f32 %v516_v62, 0.0  ;;  %v1978_v2 = vadd.f32 %v1977_v63, %v1976_v61 }
 0x16d   :  { %v1979_v3 = vpop.f32.mrf.mxu0 }
 0x16e   :  { %v594_v4 = vpack.c.bf16 %v574_v1, %v573_v0  ;;  %v521_v6 = vadd.f32 %v1978_v2, %v2707_v59 }
 0x16f   :  { %v1980_v5 = vpop.f32.mrf.mxu0 }
 0x170   :  { %v1981_v7 = vadd.f32 %v1980_v5, %v1979_v3  ;;  %2173 = vmatmul.mubr.bf16.gmra.mxu1 %v594_v4  ;;  %v575_v12 = vmax.f32 %v521_v6, 0.0 }
 0x171   :  { %v1982_v8 = vpop.f32.mrf.mxu0 }
 0x172   :  { %v524_v9 = vadd.f32 %v1981_v7, %v2707_v59 }
 0x173   :  { %v1983_v10 = vpop.f32.mrf.mxu0 }
 0x174   :  { %v576_v13 = vmax.f32 %v524_v9, 0.0  ;;  %v1984_v14 = vadd.f32 %v1983_v10, %v1982_v8 }
 0x175   :  { %v1985_v15 = vpop.f32.mrf.mxu0 }
 0x176   :  { %v595_v16 = vpack.c.bf16 %v576_v13, %v575_v12  ;;  %v529_v22 = vadd.f32 %v1984_v14, %v2707_v59 }
 0x177   :  { %v1986_v21 = vpop.f32.mrf.mxu0 }
 0x178   :  { %v1987_v23 = vadd.f32 %v1986_v21, %v1985_v15  ;;  %2176 = vmatprep.mubr.bf16.mxu1 %v595_v16  ;;  %v577_v45 = vmax.f32 %v529_v22, 0.0 }
 0x179   :  { %v1988_v38 = vpop.f32.mrf.mxu0 }
 0x17a   :  { %v532_v41 = vadd.f32 %v1987_v23, %v2707_v59 }
 0x17b   :  { %v1989_v42 = vpop.f32.mrf.mxu0 }
 0x17c   :  { %v578_v46 = vmax.f32 %v532_v41, 0.0  ;;  %v1990_v56 = vadd.f32 %v1989_v42, %v1988_v38 }
 0x17d   :  { %v1991_v57 = vpop.f32.mrf.mxu0 }
 0x17e   :  { %v596_v58 = vpack.c.bf16 %v578_v46, %v577_v45  ;;  %v537_v61 = vadd.f32 %v1990_v56, %v2707_v59 }
 0x17f   :  { %v1992_v60 = vpop.f32.mrf.mxu0 }
 0x180   :  { %v1993_v62 = vadd.f32 %v1992_v60, %v1991_v57  ;;  %2177 = vmatmul.mubr.bf16.gmra.mxu1 %v596_v58  ;;  %v579_v2 = vmax.f32 %v537_v61, 0.0 }
 0x181   :  { %v1994_v63 = vpop.f32.mrf.mxu0 }
 0x182   :  { %v540_v0 = vadd.f32 %v1993_v62, %v2707_v59 }
 0x183   :  { %v1995_v1 = vpop.f32.mrf.mxu0 }
 0x184   :  { %v580_v3 = vmax.f32 %v540_v0, 0.0  ;;  %v1996_v4 = vadd.f32 %v1995_v1, %v1994_v63 }
 0x185   :  { %v1997_v5 = vpop.f32.mrf.mxu0 }
 0x186   :  { %v597_v6 = vpack.c.bf16 %v580_v3, %v579_v2  ;;  %v545_v8 = vadd.f32 %v1996_v4, %v2707_v59 }
 0x187   :  { %v1998_v7 = vpop.f32.mrf.mxu0 }
 0x188   :  { %v1999_v9 = vadd.f32 %v1998_v7, %v1997_v5  ;;  %2180 = vmatprep.mubr.bf16.mxu1 %v597_v6  ;;  %v581_v12 = vmax.f32 %v545_v8, 0.0 }
 0x18a   :  { %v548_v10 = vadd.f32 %v1999_v9, %v2707_v59 }
 0x18c   :  { %v582_v13 = vmax.f32 %v548_v10, 0.0 }
 0x18e   :  { %v598_v14 = vpack.c.bf16 %v582_v13, %v581_v12 }
 0x190   :  { %2181 = vmatmul.mubr.bf16.gmra.mxu1 %v598_v14 }
 0x191   :  { %879 = vmatprep.mubr.bf16.mxu1 %v2608_v11 }
 0x1e0   :  { %v2154_v15 = vpop.f32.mrf.mxu0 }
 0x1e2   :  { %v697_v16 = vpop.f32.mrf.mxu0 }
 0x1e4   :  { %v2155_v22 = vpop.f32.mrf.mxu0 }
 0x1e6   :  { %v700_v38 = vpop.f32.mrf.mxu0 }
 0x1f0   :  { %v2158_v42 = vpop.f32.mrf.mxu0 }
 0x1f2   :  { %v713_v46 = vpop.f32.mrf.mxu0 }
 0x1f4   :  { %v2159_v57 = vpop.f32.mrf.mxu0 }
 0x1f6   :  { %v716_v59 = vpop.f32.mrf.mxu0 }
 0x200   :  { %v2162_v61 = vpop.f32.mrf.mxu0 }
 0x202   :  { %v729_v63 = vpop.f32.mrf.mxu0 }
 0x204   :  { %v2163_v11 = vpop.f32.mrf.mxu0 }
 0x205   :  { %v829_v51 = vpack.c.bf16 %v2163_v11, %v2162_v61 }
 0x206   :  { %v732_v2 = vpop.f32.mrf.mxu0 }
 0x207   :  { %v828_v49 = vpack.c.bf16 %v732_v2, %v729_v63 }
 0x210   :  { %v2166_v4 = vpop.f32.mrf.mxu0 }
 0x212   :  { %v745_v6 = vpop.f32.mrf.mxu0 }
 0x214   :  { %v2167_v9 = vpop.f32.mrf.mxu0 }
 0x215   :  { %v831_v13 = vpack.c.bf16 %v2167_v9, %v2166_v4 }
 0x216   :  { %v748_v55 = vpop.f32.mrf.mxu0 }
 0x217   :  { %v830_v53 = vpack.c.bf16 %v748_v55, %v745_v6 }
 0x220   :  { %v2170_v21 = vpop.f32.mrf.mxu1 }
 0x222   :  { %v761_v23 = vpop.f32.mrf.mxu1 }
 0x224   :  { %v2171_v41 = vpop.f32.mrf.mxu1 }
 0x225   :  { %v833_v9 = vpack.c.bf16 %v2171_v41, %v2170_v21 }
 0x226   :  { %v764_v45 = vpop.f32.mrf.mxu1 }
 0x227   :  { %v832_v55 = vpack.c.bf16 %v764_v45, %v761_v23 }
 0x230   :  { %v2174_v56 = vpop.f32.mrf.mxu1 }
 0x232   :  { %v777_v58 = vpop.f32.mrf.mxu1 }
 0x234   :  { %v2175_v60 = vpop.f32.mrf.mxu1 }
 0x235   :  { %v835_v48 = vpack.c.bf16 %v2175_v60, %v2174_v56 }
 0x236   :  { %v780_v62 = vpop.f32.mrf.mxu1 }
 0x237   :  { %v834_v4 = vpack.c.bf16 %v780_v62, %v777_v58 }
 0x240   :  { %v2178_v0 = vpop.f32.mrf.mxu1 }
 0x242   :  { %v793_v1 = vpop.f32.mrf.mxu1 }
 0x244   :  { %v2179_v3 = vpop.f32.mrf.mxu1 }
 0x245   :  { %v837_v52 = vpack.c.bf16 %v2179_v3, %v2178_v0 }
 0x246   :  { %v796_v5 = vpop.f32.mrf.mxu1 }
 0x247   :  { %v836_v50 = vpack.c.bf16 %v796_v5, %v793_v1 }
 0x250   :  { %v2182_v7 = vpop.f32.mrf.mxu1 }
 0x252   :  { %v809_v8 = vpop.f32.mrf.mxu1 }
 0x254   :  { %v2183_v10 = vpop.f32.mrf.mxu1 }
 0x255   :  { %v839_v12 = vpack.c.bf16 %v2183_v10, %v2182_v7  ;;  %v827_v7 = vpack.c.bf16 %v2159_v57, %v2158_v42 }
 0x256   :  { %v812_v14 = vpop.f32.mrf.mxu1 }
 0x257   :  { %v838_v54 = vpack.c.bf16 %v812_v14, %v809_v8  ;;  %2024 = vmatprep.subr.bf16.mxu1 %v839_v12  ;;  %v826_v8 = vpack.c.bf16 %v716_v59, %v713_v46 }
 0x258   :  { %2025 = vmatpush3.bf16.msra.mxu1 %v831_v13 }
 0x259   :  { %2026 = vmatprep.subr.bf16.mxu1 %v838_v54  ;;  %v825_v54 = vpack.c.bf16 %v2155_v22, %v2154_v15 }
 0x25c   :  { %2027 = vmatpush3.bf16.msra.mxu1 %v830_v53 }
 0x25d   :  { %2028 = vmatprep.subr.bf16.mxu1 %v837_v52  ;;  %v824_v52 = vpack.c.bf16 %v700_v38, %v697_v16 }
 0x260   :  { %2029 = vmatpush3.bf16.msra.mxu1 %v829_v51 }
 0x261   :  { %2030 = vmatprep.subr.bf16.mxu1 %v836_v50 }
 0x264   :  { %2031 = vmatpush3.bf16.msra.mxu1 %v828_v49 }
 0x265   :  { %2032 = vmatprep.subr.bf16.mxu1 %v835_v48 }
 0x268   :  { %2033 = vmatpush3.bf16.msra.mxu1 %v827_v7 }
 0x269   :  { %2034 = vmatprep.subr.bf16.mxu1 %v834_v4 }
 0x26c   :  { %2035 = vmatpush3.bf16.msra.mxu1 %v826_v8 }
 0x26d   :  { %2036 = vmatprep.subr.bf16.mxu1 %v833_v9 }
 0x270   :  { %2037 = vmatpush3.bf16.msra.mxu1 %v825_v54 }
 0x271   :  { %2038 = vmatprep.subr.bf16.mxu1 %v832_v55 }
 0x274   :  { %2039 = vmatpush3.bf16.msra.mxu1 %v824_v52 }
 0x277   :  { %880 = vmatmul.mubr.bf16.vlgmr.msra.gmra.mxu1 %v2611_v17  ;;  %v3644_v17 = vld [vmem:[#allocation12_spill] sm:$0xff] }
 0x278   :  { %887 = vmatprep.mubr.bf16.mxu1 %v2613_v18  ;;  %v3645_v18 = vld [vmem:[#allocation13_spill] sm:$0xff] }
 0x27f   :  { %888 = vmatmul.mubr.bf16.gmra.mxu1 %v2617_v19  ;;  %v3646_v19 = vld [vmem:[#allocation14_spill] sm:$0xff] }
 0x280   :  { %895 = vmatprep.mubr.bf16.mxu1 %v2619_v20  ;;  %v3647_v20 = vld [vmem:[#allocation15_spill] sm:$0xff] }
 0x287   :  { %896 = vmatmul.mubr.bf16.gmra.mxu1 %v2623_v24  ;;  %v3648_v24 = vld [vmem:[#allocation16_spill] sm:$0xff] }
 0x288   :  { %903 = vmatprep.mubr.bf16.mxu1 %v2625_v25  ;;  %v3649_v25 = vld [vmem:[#allocation17_spill] sm:$0xff] }
 0x28f   :  { %904 = vmatmul.mubr.bf16.gmra.mxu1 %v2629_v26  ;;  %v3650_v26 = vld [vmem:[#allocation18_spill] sm:$0xff] }
 0x290   :  { %911 = vmatprep.mubr.bf16.mxu1 %v2631_v27  ;;  %v3651_v27 = vld [vmem:[#allocation19_spill] sm:$0xff] }
 0x297   :  { %912 = vmatmul.mubr.bf16.gmra.mxu1 %v2635_v28  ;;  %v1008_v28 = vlaneseq }
 0x298   :  { %919 = vmatprep.mubr.bf16.mxu1 %v2637_v29 }
 0x29f   :  { %920 = vmatmul.mubr.bf16.gmra.mxu1 %v2641_v30  ;;  %v2776_v30 = vld [vmem:[%s3614_s4] ss:$0 sm:$0xff]  ;;  %s2565_s4 = smov [#allocation8]  }
 0x2a0   :  { %927 = vmatprep.mubr.bf16.mxu1 %v2643_v31  ;;  %s1817_s12 = sshll.u32 %s2565_s4, 4  ;;  %s1818_s12 = int_to_ptr.vmem [resolvable:$true] %s1817_s12 }
 0x2a1   :  { %s2532_s13 = scalar_lea.vmem %s1818_s12, 4096  ;;  %p2537_p2 = scmp.lt.s32.totalorder %s1818_s12, %s1818_s12 }
 0x2a2   :  { %p2533_p1 = scmp.ne.s32.totalorder %s1818_s12, %s2532_s13  ;;  %p2538_p3 = scmp.lt.s32.totalorder %s2532_s13, %s2532_s13 }
 0x2a4   :  { %p2539_p4 = por %p2538_p3, %p2537_p2 }
 0x2a6   :  { %p2540_p5 = pnand %p2539_p4, %p2533_p1 }
 0x2a7   :  { %928 = vmatmul.mubr.bf16.gmra.mxu1 %v2647_v32  ;;  %v2778_v32 = vand.u32 127, %v1008_v28 }
 0x2a8   :  { %935 = vmatprep.mubr.bf16.mxu1 %v2649_v33 }
 0x2a9   :  { %vm1010_vm0 = vcmp.lt.s32.totalorder %v2778_v32, 16  ;;  %vm1011_vm3 = vcmp.eq.s32.totalorder %v2778_v32, 16 }
 0x2af   :  { %936 = vmatmul.mubr.bf16.gmra.mxu1 %v2653_v34 }
 0x2b0   :  { %943 = vmatprep.mubr.bf16.mxu1 %v2655_v35 }
 0x2b7   :  { %944 = vmatmul.mubr.bf16.gmra.mxu1 %v2659_v36 }
 0x2b8   :  { %951 = vmatprep.mubr.bf16.mxu1 %v2661_v37 }
 0x2bf   :  { %952 = vmatmul.mubr.bf16.gmra.mxu1 %v2665_v39 }
 0x2c0   :  { %959 = vmatprep.mubr.bf16.mxu1 %v2667_v40 }
 0x2c7   :  { %960 = vmatmul.mubr.bf16.gmra.mxu1 %v2671_v43 }
 0x2c8   :  { %967 = vmatprep.mubr.bf16.mxu1 %v2673_v44 }
 0x2cf   :  { %968 = vmatmul.mubr.bf16.gmra.mxu1 %v2677_v47 }
 0x2d0   :  { %975 = vmatprep.mubr.bf16.mxu1 %v3644_v17 }
 0x2d7   :  { %976 = vmatmul.mubr.bf16.gmra.mxu1 %v3645_v18 }
 0x2d8   :  { %983 = vmatprep.mubr.bf16.mxu1 %v3646_v19 }
 0x2df   :  { %984 = vmatmul.mubr.bf16.gmra.mxu1 %v3647_v20 }
 0x2e0   :  { %991 = vmatprep.mubr.bf16.mxu1 %v3648_v24 }
 0x2e7   :  { %992 = vmatmul.mubr.bf16.gmra.mxu1 %v3649_v25 }
 0x2e8   :  { %999 = vmatprep.mubr.bf16.mxu1 %v3650_v26 }
 0x2ef   :  { %1000 = vmatmul.mubr.bf16.gmra.mxu1 %v3651_v27 }
 0x337   :  { %v2040_v29 = vpop.f32.mrf.mxu1 }
 0x339   :  { %v2041_v31 = vpop.f32.mrf.mxu1 }
 0x33a   :  { %v2042_v33 = vadd.f32 %v2041_v31, %v2040_v29 }
 0x33b   :  { %v2043_v34 = vpop.f32.mrf.mxu1 }
 0x33c   :  { %v2781_v35 = vadd.f32 %v2042_v33, %v2776_v30 }
 0x33d   :  { %v2044_v36 = vpop.f32.mrf.mxu1 }
 0x33e   :  { %v2045_v37 = vadd.f32 %v2044_v36, %v2043_v34  ;;  %v1012_v39 = vmul.f32 %v2781_v35, %v2781_v35 }
 0x33f   :  { %v2046_v40 = vpop.f32.mrf.mxu1 }
 0x340   :  { %v2787_v43 = vadd.f32 %v2045_v37, %v2776_v30  ;;  %v1044_v44 = vsel %vm1010_vm0, %v1012_v39, 0.0 }
 0x341   :  { %v2047_v47 = vpop.f32.mrf.mxu1  ;;  %1076 = vadd.xlane.f32.xlu0 %v1044_v44 }
 0x342   :  { %v2048_v48 = vadd.f32 %v2047_v47, %v2046_v40  ;;  %v1013_v50 = vmul.f32 %v2787_v43, %v2787_v43 }
 0x343   :  { %v2049_v49 = vpop.f32.mrf.mxu1 }
 0x344   :  { %v2794_v51 = vadd.f32 %v2048_v48, %v2776_v30  ;;  %v1045_v15 = vsel %vm1010_vm0, %v1013_v50, 0.0 }
 0x345   :  { %v2050_v53 = vpop.f32.mrf.mxu1  ;;  %1078 = vadd.xlane.f32.xlu0 %v1045_v15 }
 0x346   :  { %v2051_v16 = vadd.f32 %v2050_v53, %v2049_v49  ;;  %v1014_v22 = vmul.f32 %v2794_v51, %v2794_v51 }
 0x347   :  { %v2052_v21 = vpop.f32.mrf.mxu1 }
 0x348   :  { %v2801_v23 = vadd.f32 %v2051_v16, %v2776_v30  ;;  %v1046_v41 = vsel %vm1010_vm0, %v1014_v22, 0.0 }
 0x349   :  { %v2053_v38 = vpop.f32.mrf.mxu1  ;;  %1080 = vadd.xlane.f32.xlu1 %v1046_v41 }
 0x34a   :  { %v2054_v42 = vadd.f32 %v2053_v38, %v2052_v21  ;;  %v1015_v46 = vmul.f32 %v2801_v23, %v2801_v23 }
 0x34b   :  { %v2055_v45 = vpop.f32.mrf.mxu1 }
 0x34c   :  { %v2808_v56 = vadd.f32 %v2054_v42, %v2776_v30  ;;  %v1047_v58 = vsel %vm1010_vm0, %v1015_v46, 0.0 }
 0x34d   :  { %v2056_v57 = vpop.f32.mrf.mxu1  ;;  %1082 = vadd.xlane.f32.xlu1 %v1047_v58 }
 0x34e   :  { %v2057_v59 = vadd.f32 %v2056_v57, %v2055_v45  ;;  %v1016_v61 = vmul.f32 %v2808_v56, %v2808_v56 }
 0x34f   :  { %v2058_v60 = vpop.f32.mrf.mxu1 }
 0x350   :  { %v2815_v62 = vadd.f32 %v2057_v59, %v2776_v30  ;;  %v1048_v0 = vsel %vm1010_vm0, %v1016_v61, 0.0 }
 0x351   :  { %v2059_v63 = vpop.f32.mrf.mxu1  ;;  %1084 = vadd.xlane.f32.xlu0 %v1048_v0 }
 0x352   :  { %v2060_v11 = vadd.f32 %v2059_v63, %v2058_v60  ;;  %v1017_v2 = vmul.f32 %v2815_v62, %v2815_v62 }
 0x353   :  { %v2061_v1 = vpop.f32.mrf.mxu1 }
 0x354   :  { %v2822_v3 = vadd.f32 %v2060_v11, %v2776_v30  ;;  %v1049_v6 = vsel %vm1010_vm0, %v1017_v2, 0.0 }
 0x355   :  { %v2062_v5 = vpop.f32.mrf.mxu1  ;;  %1086 = vadd.xlane.f32.xlu1 %v1049_v6 }
 0x356   :  { %v2063_v10 = vadd.f32 %v2062_v5, %v2061_v1  ;;  %v1018_v13 = vmul.f32 %v2822_v3, %v2822_v3 }
 0x357   :  { %v2064_v12 = vpop.f32.mrf.mxu1 }
 0x358   :  { %v2829_v14 = vadd.f32 %v2063_v10, %v2776_v30  ;;  %v1050_v8 = vsel %vm1010_vm0, %v1018_v13, 0.0 }
 0x359   :  { %v2065_v7 = vpop.f32.mrf.mxu1  ;;  %1088 = vadd.xlane.f32.xlu0 %v1050_v8 }
 0x35a   :  { %v1019_v54 = vmul.f32 %v2829_v14, %v2829_v14  ;;  %v2066_v52 = vadd.f32 %v2065_v7, %v2064_v12 }
 0x35b   :  { %v2067_v4 = vpop.f32.mrf.mxu1 }
 0x35c   :  { %v1051_v17 = vsel %vm1010_vm0, %v1019_v54, 0.0  ;;  %v2838_v20 = vadd.f32 %v2066_v52, %v2776_v30 }
 0x35d   :  { %v2068_v9 = vpop.f32.mrf.mxu1  ;;  %1090 = vadd.xlane.f32.xlu1 %v1051_v17 }
 0x35e   :  { %v2069_v26 = vadd.f32 %v2068_v9, %v2067_v4  ;;  %v1020_v27 = vmul.f32 %v2838_v20, %v2838_v20 }
 0x35f   :  { %v2070_v55 = vpop.f32.mrf.mxu1 }
 0x360   :  { %v2843_v31 = vadd.f32 %v2069_v26, %v2776_v30  ;;  %v1052_v33 = vsel %vm1010_vm0, %v1020_v27, 0.0 }
 0x361   :  { %v2071_v18 = vpop.f32.mrf.mxu1  ;;  %1092 = vadd.xlane.f32.xlu0 %v1052_v33 }
 0x362   :  { %v2072_v34 = vadd.f32 %v2071_v18, %v2070_v55  ;;  %v1021_v39 = vmul.f32 %v2843_v31, %v2843_v31 }
 0x363   :  { %v2073_v19 = vpop.f32.mrf.mxu1 }
 0x364   :  { %v2850_v40 = vadd.f32 %v2072_v34, %v2776_v30  ;;  %v1053_v47 = vsel %vm1010_vm0, %v1021_v39, 0.0 }
 0x365   :  { %v2074_v24 = vpop.f32.mrf.mxu1  ;;  %1094 = vadd.xlane.f32.xlu1 %v1053_v47 }
 0x366   :  { %v1022_v49 = vmul.f32 %v2850_v40, %v2850_v40  ;;  %v2075_v16 = vadd.f32 %v2074_v24, %v2073_v19 }
 0x367   :  { %v2076_v25 = vpop.f32.mrf.mxu1 }
 0x368   :  { %v1054_v53 = vsel %vm1010_vm0, %v1022_v49, 0.0  ;;  %v2859_v42 = vadd.f32 %v2075_v16, %v2776_v30 }
 0x369   :  { %v2077_v28 = vpop.f32.mrf.mxu1  ;;  %1096 = vadd.xlane.f32.xlu0 %v1054_v53 }
 0x36a   :  { %v2078_v21 = vadd.f32 %v2077_v28, %v2076_v25  ;;  %v1023_v59 = vmul.f32 %v2859_v42, %v2859_v42 }
 0x36b   :  { %v2079_v29 = vpop.f32.mrf.mxu1 }
 0x36c   :  { %v2862_v45 = vadd.f32 %v2078_v21, %v2776_v30  ;;  %v1055_v63 = vsel %vm1010_vm0, %v1023_v59, 0.0 }
 0x36d   :  { %v2080_v36 = vpop.f32.mrf.mxu1  ;;  %1098 = vadd.xlane.f32.xlu1 %v1055_v63  ;;  %v1238_v63 = vand.u32 2147483647, %v2794_v51 }
 0x36e   :  { %v2081_v38 = vadd.f32 %v2080_v36, %v2079_v29  ;;  %v1024_v60 = vmul.f32 %v2862_v45, %v2862_v45 }
 0x36f   :  { %v2082_v37 = vpop.f32.mrf.mxu1 }
 0x370   :  { %v2865_v57 = vadd.f32 %v2081_v38, %v2776_v30  ;;  %v1056_v0 = vsel %vm1010_vm0, %v1024_v60, 0.0  ;;  %v1236_v38 = vand.u32 2147483647, %v2781_v35 }
 0x371   :  { %v2083_v44 = vpop.f32.mrf.mxu1  ;;  %1100 = vadd.xlane.f32.xlu0 %v1056_v0 }
 0x372   :  { %v1025_v11 = vmul.f32 %v2865_v57, %v2865_v57  ;;  %v2084_v2 = vadd.f32 %v2083_v44, %v2082_v37  ;;  %v1268_v60 = vsub.f32 0.0, %v1236_v38 }
 0x373   :  { %v2085_v48 = vpop.f32.mrf.mxu1 }
 0x374   :  { %v1057_v6 = vsel %vm1010_vm0, %v1025_v11, 0.0  ;;  %v2880_v12 = vadd.f32 %v2084_v2, %v2776_v30 }
 0x375   :  { %v2086_v50 = vpop.f32.mrf.mxu1  ;;  %1102 = vadd.xlane.f32.xlu1 %v1057_v6 }
 0x376   :  { %v2087_v13 = vadd.f32 %v2086_v50, %v2085_v48  ;;  %v1026_v54 = vmul.f32 %v2880_v12, %v2880_v12 }
 0x377   :  { %v2088_v15 = vpop.f32.mrf.mxu1 }
 0x378   :  { %v2883_v9 = vadd.f32 %v2087_v13, %v2776_v30  ;;  %v1058_v18 = vsel %vm1010_vm0, %v1026_v54, 0.0 }
 0x379   :  { %v2089_v22 = vpop.f32.mrf.mxu1  ;;  %1104 = vadd.xlane.f32.xlu0 %v1058_v18 }
 0x37a   :  { %v2090_v7 = vadd.f32 %v2089_v22, %v2088_v15  ;;  %v1027_v24 = vmul.f32 %v2883_v9, %v2883_v9 }
 0x37b   :  { %v2091_v41 = vpop.f32.mrf.mxu1 }
 0x37c   :  { %v2888_v55 = vadd.f32 %v2090_v7, %v2776_v30  ;;  %v1059_v29 = vsel %vm1010_vm0, %v1027_v24, 0.0  ;;  %v1240_v24 = vand.u32 2147483647, %v2808_v56 }
 0x37d   :  { %v2092_v46 = vpop.f32.mrf.mxu1  ;;  %1106 = vadd.xlane.f32.xlu1 %v1059_v29 }
 0x37e   :  { %v2093_v52 = vadd.f32 %v2092_v46, %v2091_v41  ;;  %v1028_v27 = vmul.f32 %v2888_v55, %v2888_v55 }
 0x37f   :  { %v2094_v58 = vpop.f32.mrf.mxu1 }
 0x380   :  { %v2895_v25 = vadd.f32 %v2093_v52, %v2776_v30  ;;  %v1060_v33 = vsel %vm1010_vm0, %v1028_v27, 0.0  ;;  %v1241_v27 = vand.u32 2147483647, %v2815_v62 }
 0x381   :  { %v2095_v61 = vpop.f32.mrf.mxu1  ;;  %1108 = vadd.xlane.f32.xlu0 %v1060_v33 }
 0x382   :  { %v2096_v26 = vadd.f32 %v2095_v61, %v2094_v58  ;;  %v1029_v37 = vmul.f32 %v2895_v25, %v2895_v25  ;;  %v1237_v58 = vand.u32 2147483647, %v2787_v43 }
 0x383   :  { %v2097_v1 = vpop.f32.mrf.mxu1 }
 0x384   :  { %v2904_v36 = vadd.f32 %v2096_v26, %v2776_v30  ;;  %v1061_v47 = vsel %vm1010_vm0, %v1029_v37, 0.0  ;;  %v1269_v0 = vsub.f32 0.0, %v1237_v58  ;;  %v1243_v58 = vand.u32 2147483647, %v2829_v14 }
 0x385   :  { %v2098_v5 = vpop.f32.mrf.mxu1  ;;  %1110 = vadd.xlane.f32.xlu1 %v1061_v47 }
 0x386   :  { %v2099_v48 = vadd.f32 %v2098_v5, %v2097_v1  ;;  %v1030_v49 = vmul.f32 %v2904_v36, %v2904_v36  ;;  %v1300_v5 = vmul.f32 1.442695, %v1268_v60  ;;  %v1302_v13 = vmul.f32 1.442695, %v1269_v0 }
 0x387   :  { %v2100_v10 = vpop.f32.mrf.mxu1 }
 0x388   :  { %v1062_v53 = vsel %vm1010_vm0, %v1030_v49, 0.0  ;;  %v2915_v15 = vadd.f32 %v2099_v48, %v2776_v30  ;;  %2280 = vpow2.f32 %v1300_v5  ;;  %v1272_v48 = vsub.f32 0.0, %v1240_v24 }
 0x389   :  { %v2101_v4 = vpop.f32.mrf.mxu1  ;;  %1112 = vadd.xlane.f32.xlu0 %v1062_v53  ;;  %2282 = vpow2.f32 %v1302_v13  ;;  %v1273_v49 = vsub.f32 0.0, %v1241_v27  ;;  %v1245_v27 = vand.u32 2147483647, %v2843_v31 }
 0x38a   :  { %v1031_v21 = vmul.f32 %v2915_v15, %v2915_v15  ;;  %v2102_v41 = vadd.f32 %v2101_v4, %v2100_v10  ;;  %v1270_v10 = vsub.f32 0.0, %v1238_v63 }
 0x38b   :  { %v2103_v8 = vpop.f32.mrf.mxu1  ;;  %v1310_v60 = vmul.f32 1.442695, %v1273_v49 }
 0x38c   :  { %v1063_v46 = vsel %vm1010_vm0, %v1031_v21, 0.0  ;;  %v2924_v61 = vadd.f32 %v2102_v41, %v2776_v30  ;;  %v1242_v21 = vand.u32 2147483647, %v2822_v3 }
 0x38d   :  { %v2104_v17 = vpop.f32.mrf.mxu1  ;;  %1114 = vadd.xlane.f32.xlu1 %v1063_v46  ;;  %v1308_v46 = vmul.f32 1.442695, %v1272_v48 }
 0x38e   :  { %v2105_v11 = vadd.f32 %v2104_v17, %v2103_v8  ;;  %v1032_v6 = vmul.f32 %v2924_v61, %v2924_v61  ;;  %v1304_v8 = vmul.f32 1.442695, %v1270_v10  ;;  %v1239_v17 = vand.u32 2147483647, %v2801_v23 }
 0x38f   :  { %v2106_v19 = vpop.f32.mrf.mxu1  ;;  %v1274_v0 = vsub.f32 0.0, %v1242_v21  ;;  %v1275_v10 = vsub.f32 0.0, %v1243_v58  ;;  %v1277_v21 = vsub.f32 0.0, %v1245_v27 }
 0x390   :  { %v2930_v7 = vadd.f32 %v2105_v11, %v2776_v30  ;;  %v1064_v52 = vsel %vm1010_vm0, %v1032_v6, 0.0  ;;  %2284 = vpow2.f32 %v1304_v8  ;;  %v1271_v29 = vsub.f32 0.0, %v1239_v17 }
 0x391   :  { %v2107_v28 = vpop.f32.mrf.mxu1  ;;  %1116 = vadd.xlane.f32.xlu0 %v1064_v52 }
 0x392   :  { %v2108_v2 = vadd.f32 %v2107_v28, %v2106_v19  ;;  %v1033_v18 = vmul.f32 %v2930_v7, %v2930_v7  ;;  %v1306_v53 = vmul.f32 1.442695, %v1271_v29 }
 0x393   :  { %v2109_v34 = vpop.f32.mrf.mxu1 }
 0x394   :  { %v2933_v54 = vadd.f32 %v2108_v2, %v2776_v30  ;;  %v1065_v28 = vsel %vm1010_vm0, %v1033_v18, 0.0  ;;  %2286 = vpow2.f32 %v1306_v53  ;;  %v1314_v18 = vmul.f32 1.442695, %v1275_v10 }
 0x395   :  { %v2110_v39 = vpop.f32.mrf.mxu1  ;;  %1118 = vadd.xlane.f32.xlu1 %v1065_v28  ;;  %v2955_v63 = vpop.eup %2280  ;;  %2288 = vpow2.f32 %v1308_v46 }
 0x396   :  { %v1034_v26 = vmul.f32 %v2933_v54, %v2933_v54  ;;  %v2111_v33 = vadd.f32 %v2110_v39, %v2109_v34  ;;  %v2959_v6 = vpop.eup %2282  ;;  %2290 = vpow2.f32 %v1310_v60  ;;  %v1367_v46 = vmul.f32 -0.5, %v2955_v63 }
 0x397   :  { %v2112_v44 = vpop.f32.mrf.mxu1 }
 0x398   :  { %v1066_v37 = vsel %vm1010_vm0, %v1034_v26, 0.0  ;;  %v2952_v38 = vadd.f32 %v2111_v33, %v2776_v30 }
 0x399   :  { %v2113_v50 = vpop.f32.mrf.mxu1  ;;  %1120 = vadd.xlane.f32.xlu0 %v1066_v37 }
 0x39a   :  { %v2114_v34 = vadd.f32 %v2113_v50, %v2112_v44  ;;  %v1035_v11 = vmul.f32 %v2952_v38, %v2952_v38  ;;  %v1364_v50 = vadd.f32 1.0, %v2955_v63 }
 0x39b   :  { %v2115_v16 = vpop.f32.mrf.mxu1 }
 0x39c   :  { %v2962_v13 = vadd.f32 %v2114_v34, %v2776_v30  ;;  %2292 = vlog2.f32 %v1364_v50  ;;  %v1376_v34 = vmul.f32 -0.5, %v2959_v6 }
 0x39d   :  { %v2116_v22 = vpop.f32.mrf.mxu1  ;;  %v2970_v52 = vpop.eup %2284 }
 0x39e   :  { %v2117_v39 = vadd.f32 %v2116_v22, %v2115_v16  ;;  %v1312_v16 = vmul.f32 1.442695, %v1274_v0  ;;  %v1067_v22 = vsel %vm1010_vm0, %v1035_v11, 0.0  ;;  %v1036_v24 = vmul.f32 %v2962_v13, %v2962_v13 }
 0x39f   :  { %v2118_v59 = vpop.f32.mrf.mxu1  ;;  %1122 = vadd.xlane.f32.xlu1 %v1067_v22  ;;  %v1382_v29 = vadd.f32 1.0, %v2970_v52  ;;  %v1248_v0 = vand.u32 2147483647, %v2862_v45 }
 0x3a0   :  { %v2965_v44 = vadd.f32 %v2117_v39, %v2776_v30  ;;  %2294 = vpow2.f32 %v1312_v16  ;;  %v1068_v33 = vsel %vm1010_vm0, %v1036_v24, 0.0  ;;  %v1318_v16 = vmul.f32 1.442695, %v1277_v21 }
 0x3a1   :  { %v2119_v1 = vpop.f32.mrf.mxu1  ;;  %1124 = vadd.xlane.f32.xlu0 %v1068_v33  ;;  %v2995_v58 = vpop.eup %2286  ;;  %v1370_v24 = vand.u32 2147483647, %v2955_v63  ;;  %v1246_v33 = vand.u32 2147483647, %v2850_v40 }
 0x3a2   :  { %v2120_v2 = vadd.f32 %v2119_v1, %v2118_v59  ;;  %v1373_v59 = vadd.f32 1.0, %v2959_v6  ;;  %v1244_v1 = vand.u32 2147483647, %v2838_v20  ;;  %v1037_v26 = vmul.f32 %v2965_v44, %v2965_v44  ;;  %v3001_v10 = vpop.eup %2288 }
 0x3a3   :  { %v2121_v4 = vpop.f32.mrf.mxu1  ;;  %vm3024_vm1 = vcmp.lt.f32.partialorder %v1370_v24, 0.0004427343 }
 0x3a4   :  { %v2975_v8 = vadd.f32 %v2120_v2, %v2776_v30  ;;  %v1069_v37 = vsel %vm1010_vm0, %v1037_v26, 0.0  ;;  %2296 = vlog2.f32 %v1373_v59  ;;  %v1276_v48 = vsub.f32 0.0, %v1244_v1  ;;  %v3007_v1 = vpop.eup %2290 }
 0x3a5   :  { %v2122_v19 = vpop.f32.mrf.mxu1  ;;  %1126 = vadd.xlane.f32.xlu1 %v1069_v37  ;;  %2298 = vpow2.f32 %v1314_v18  ;;  %v1368_v18 = vadd.f32 1.0, %v1367_v46  ;;  %v1391_v26 = vadd.f32 1.0, %v2995_v58  ;;  %v1409_v21 = vadd.f32 1.0, %v3007_v1 }
 0x3a6   :  { %3652 = vst [vmem:[#allocation12_spill] sm:$0xff] %v2975_v8  ;;  %v2123_v28 = vadd.f32 %v2122_v19, %v2121_v4  ;;  %v1038_v49 = vmul.f32 %v2975_v8, %v2975_v8  ;;  %2300 = vlog2.f32 %v1382_v29  ;;  %v1316_v39 = vmul.f32 1.442695, %v1276_v48 }
 0x3a7   :  { %v2948_v47 = vpop.f32.mrf.mxu1  ;;  %v1379_v29 = vand.u32 2147483647, %v2959_v6  ;;  %v1400_v48 = vadd.f32 1.0, %v3001_v10  ;;  %v1369_v46 = vmul.f32 %v2955_v63, %v1368_v18  ;;  %v1278_v63 = vsub.f32 0.0, %v1246_v33 }
 0x3a8   :  { %v2990_v4 = vadd.f32 %v2123_v28, %v2776_v30  ;;  %v1070_v19 = vsel %vm1010_vm0, %v1038_v49, 0.0  ;;  %v1377_v28 = vadd.f32 1.0, %v1376_v34  ;;  %2302 = vpow2.f32 %v1316_v39 }
 0x3a9   :  { %v2125_v41 = vpop.f32.mrf.mxu1  ;;  %1128 = vadd.xlane.f32.xlu0 %v1070_v19  ;;  %2304 = vpow2.f32 %v1318_v16  ;;  %v2293_v19 = vpop.eup %2292  ;;  %vm3034_vm2 = vcmp.lt.f32.partialorder %v1379_v29, 0.0004427343 }
 0x3aa   :  { %3653 = vst [vmem:[#allocation13_spill] sm:$0xff] %v2990_v4  ;;  %v2126_v22 = vadd.f32 %v2125_v41, %v2948_v47  ;;  %v1039_v59 = vmul.f32 %v2990_v4, %v2990_v4  ;;  %v1385_v47 = vmul.f32 -0.5, %v2970_v52  ;;  %2306 = vlog2.f32 %v1391_v26 }
 0x3ab   :  { %v2127_v5 = vpop.f32.mrf.mxu1  ;;  %v1378_v16 = vmul.f32 %v2959_v6, %v1377_v28  ;;  %v1388_v26 = vand.u32 2147483647, %v2970_v52  ;;  %2308 = vlog2.f32 %v1400_v48  ;;  %v1247_v6 = vand.u32 2147483647, %v2859_v42 }
 0x3ac   :  { %v1386_v41 = vadd.f32 1.0, %v1385_v47  ;;  %2310 = vlog2.f32 %v1409_v21  ;;  %v1320_v21 = vmul.f32 1.442695, %v1278_v63  ;;  %v1397_v63 = vand.u32 2147483647, %v2995_v58 }
 0x3ad   :  { %v2128_v17 = vpop.f32.mrf.mxu1  ;;  %v3031_v49 = vpop.eup %2294  ;;  %vm3080_vm4 = vcmp.lt.f32.partialorder %v1388_v26, 0.0004427343 }
 0x3ae   :  { %v2129_v27 = vadd.f32 %v2128_v17, %v2127_v5  ;;  %v3019_v5 = vadd.f32 %v2126_v22, %v2776_v30  ;;  %v1071_v17 = vsel %vm1010_vm0, %v1039_v59, 0.0  ;;  %v1418_v29 = vadd.f32 1.0, %v3031_v49 }
 0x3af   :  { %v2130_v53 = vpop.f32.mrf.mxu1  ;;  %1130 = vadd.xlane.f32.xlu1 %v1071_v17  ;;  %v1366_v17 = vmul.f32 0.6931472, %v2293_v19  ;;  %vm3084_vm5 = vcmp.lt.f32.partialorder %v1397_v63, 0.0004427343  ;;  %v1412_v22 = vmul.f32 -0.5, %v3007_v1 }
 0x3b0   :  { %3654 = vst [vmem:[#allocation14_spill] sm:$0xff] %v3019_v5  ;;  %v3029_v39 = vadd.f32 %v2129_v27, %v2776_v30  ;;  %v1040_v28 = vmul.f32 %v3019_v5, %v3019_v5  ;;  %2312 = vlog2.f32 %v1418_v29 }
 0x3b1   :  { %v2131_v60 = vpop.f32.mrf.mxu1  ;;  %v2297_v24 = vpop.eup %2296  ;;  %2314 = vpow2.f32 %v1320_v21 }
 0x3b2   :  { %3657 = vst [vmem:[#allocation15_spill] sm:$0xff] %v3029_v39  ;;  %v2132_v27 = vadd.f32 %v2131_v60, %v2130_v53  ;;  %v3040_v50 = vpop.eup %2298  ;;  %v1041_v47 = vmul.f32 %v3029_v39, %v3029_v39  ;;  %v1394_v53 = vmul.f32 -0.5, %v2995_v58  ;;  %v1072_v19 = vsel %vm1010_vm0, %v1040_v28, 0.0 }
 0x3b3   :  { %v2133_v37 = vpop.f32.mrf.mxu1  ;;  %v2301_v48 = vpop.eup %2300  ;;  %v1375_v2 = vmul.f32 0.6931472, %v2297_v24  ;;  %v1427_v11 = vadd.f32 1.0, %v3040_v50  ;;  %1132 = vadd.xlane.f32.xlu0 %v1072_v19  ;;  %v1279_v60 = vsub.f32 0.0, %v1247_v6  ;;  %v1387_v19 = vmul.f32 %v2970_v52, %v1386_v41 }
 0x3b4   :  { %v3047_v33 = vadd.f32 %v2132_v27, %v2776_v30  ;;  %v1384_v28 = vmul.f32 0.6931472, %v2301_v48  ;;  %v1424_v39 = vand.u32 2147483647, %v3031_v49 }
 0x3b5   :  { %v2134_v18 = vpop.f32.mrf.mxu1  ;;  %v3072_v34 = vpop.eup %2302  ;;  %v1381_v48 = vsel %vm3034_vm2, %v1378_v16, %v1375_v2  ;;  %2316 = vlog2.f32 %v1427_v11  ;;  %v1406_v16 = vand.u32 2147483647, %v3001_v10 }
 0x3b6   :  { %3660 = vst [vmem:[#allocation16_spill] sm:$0xff] %v3047_v33  ;;  %v2135_v59 = vadd.f32 %v2134_v18, %v2133_v37  ;;  %v1073_v37 = vsel %vm1010_vm0, %v1041_v47, 0.0  ;;  %v1372_v18 = vsel %vm3024_vm1, %v1369_v46, %v1366_v17  ;;  %v1042_v24 = vmul.f32 %v3047_v33, %v3047_v33 }
 0x3b7   :  { %1134 = vadd.xlane.f32.xlu1 %v1073_v37  ;;  %v1395_v47 = vadd.f32 1.0, %v1394_v53  ;;  %v3662_v17 = vmax.f32 %v2781_v35, 0.0  ;;  %v1322_v53 = vmul.f32 1.442695, %v1279_v60  ;;  %v3088_v37 = vpop.eup %2304  ;;  %v1390_v11 = vsel %vm3080_vm4, %v1387_v19, %v1384_v28 }
 0x3b8   :  { %v3057_v27 = vadd.f32 %v2135_v59, %v2776_v30  ;;  %v1403_v30 = vmul.f32 -0.5, %v3001_v10  ;;  %v1074_v46 = vsel %vm1010_vm0, %v1042_v24, 0.0  ;;  %v2307_v26 = vpop.eup %2306  ;;  %v1436_v24 = vadd.f32 1.0, %v3072_v34 }
 0x3b9   :  { %v1652_v6 = vadd.f32 %v1372_v18, %v3662_v17  ;;  %1136 = vadd.xlane.f32.xlu0 %v1074_v46  ;;  %v3667_v18 = vmax.f32 %v2787_v43, 0.0  ;;  %v1280_v46 = vsub.f32 0.0, %v1248_v0  ;;  %v1396_v17 = vmul.f32 %v2995_v58, %v1395_v47  ;;  %v2309_v41 = vpop.eup %2308 }
 0x3ba   :  { %3661 = vst [vmem:[#allocation17_spill] sm:$0xff] %v3057_v27  ;;  %v1043_v52 = vmul.f32 %v3057_v27, %v3057_v27  ;;  %v1404_v2 = vadd.f32 1.0, %v1403_v30  ;;  %v1421_v28 = vmul.f32 -0.5, %v3031_v49  ;;  %v1249_v19 = vand.u32 2147483647, %v2865_v57 }
 0x3bb   :  { %v1653_v63 = vadd.f32 %v1381_v48, %v3667_v18  ;;  %v3668_v27 = vmax.f32 %v2794_v51, 0.0  ;;  %v1415_v48 = vand.u32 2147483647, %v3007_v1  ;;  %v1445_v0 = vadd.f32 1.0, %v3088_v37  ;;  %v2311_v18 = vpop.eup %2310 }
 0x3bc   :  { %v1075_v60 = vsel %vm1010_vm0, %v1043_v52, 0.0  ;;  %v1393_v52 = vmul.f32 0.6931472, %v2307_v26  ;;  %vm3107_vm6 = vcmp.lt.f32.partialorder %v1406_v16, 0.0004427343  ;;  %v1413_v47 = vadd.f32 1.0, %v1412_v22 }
 0x3bd   :  { %1138 = vadd.xlane.f32.xlu1 %v1075_v60  ;;  %v1654_v33 = vadd.f32 %v1390_v11, %v3668_v27  ;;  %v1685_v60 = vadd.f32 10.0, %v1653_v63  ;;  %v1324_v5 = vmul.f32 1.442695, %v1280_v46  ;;  %v1422_v4 = vadd.f32 1.0, %v1421_v28 }
 0x3be   :  { %vm3114_vm7 = vcmp.lt.f32.partialorder %v1415_v48, 0.0004427343  ;;  %v1399_v16 = vsel %vm3084_vm5, %v1396_v17, %v1393_v52  ;;  %v1411_v22 = vmul.f32 0.6931472, %v2311_v18  ;;  %v1430_v63 = vmul.f32 -0.5, %v3040_v50 }
 0x3bf   :  { %v1686_v8 = vadd.f32 10.0, %v1654_v33  ;;  %v3123_v46 = vsel %vm1011_vm3, %v1685_v60, 0.0  ;;  %v1414_v33 = vmul.f32 %v3007_v1, %v1413_v47  ;;  %vm3126_vm8 = vcmp.lt.f32.partialorder %v1424_v39, 0.0004427343 }
 0x3c0   :  { %v1423_v29 = vmul.f32 %v3031_v49, %v1422_v4  ;;  %v1433_v17 = vand.u32 2147483647, %v3040_v50  ;;  %v3675_v1 = vmax.f32 %v2801_v23, 0.0  ;;  %v1431_v18 = vadd.f32 1.0, %v1430_v63 }
 0x3c1   :  { %v3136_v48 = vsel %vm1011_vm3, %v1686_v8, 0.0  ;;  %v1417_v4 = vsel %vm3114_vm7, %v1414_v33, %v1411_v22  ;;  %v1439_v52 = vmul.f32 -0.5, %v3072_v34  ;;  %v1250_v47 = vand.u32 2147483647, %v2880_v12 }
 0x3c2   :  { %v1655_v39 = vadd.f32 %v1399_v16, %v3675_v1  ;;  %v3676_v60 = vmax.f32 %v2808_v56, 0.0  ;;  %v1252_v33 = vand.u32 2147483647, %v2888_v55  ;;  %vm3161_vm9 = vcmp.lt.f32.partialorder %v1433_v17, 0.0004427343 }
 0x3ca   :  { %v1077_v59 = vpop.xlane.xlu0 %1076 }
 0x3cb   :  { %2318 = vrsqrt.f32 %v1077_v59  ;;  %v1684_v59 = vadd.f32 10.0, %v1652_v6  ;;  %v1405_v6 = vmul.f32 %v3001_v10, %v1404_v2  ;;  %v1402_v10 = vmul.f32 0.6931472, %v2309_v41 }
 0x3cc   :  { %2320 = vpow2.f32 %v1322_v53  ;;  %v1281_v53 = vsub.f32 0.0, %v1249_v19 }
 0x3cd   :  { %2322 = vlog2.f32 %v1436_v24  ;;  %v1716_v11 = vsel %vm1011_vm3, %v1684_v59, 0.0  ;;  %v2313_v24 = vpop.eup %2312  ;;  %v1448_v59 = vmul.f32 -0.5, %v3088_v37 }
 0x3ce   :  { %v1079_v30 = vpop.xlane.xlu0 %1078  ;;  %v3130_v19 = vpop.eup %2314  ;;  %v1420_v49 = vmul.f32 0.6931472, %v2313_v24  ;;  %v1432_v24 = vmul.f32 %v3040_v50, %v1431_v18 }
 0x3cf   :  { %2324 = vrsqrt.f32 %v1079_v30  ;;  %v2317_v41 = vpop.eup %2316  ;;  %v1454_v2 = vadd.f32 1.0, %v3130_v19 }
 0x3d0   :  { %2326 = vlog2.f32 %v1445_v0  ;;  %v1429_v58 = vmul.f32 0.6931472, %v2317_v41  ;;  %v1426_v63 = vsel %vm3126_vm8, %v1423_v29, %v1420_v49 }
 0x3d2   :  { %v1081_v21 = vpop.xlane.xlu1 %1080 }
 0x3d3   :  { %2328 = vrsqrt.f32 %v1081_v21  ;;  %v1326_v21 = vmul.f32 1.442695, %v1281_v53 }
 0x3d4   :  { %2330 = vpow2.f32 %v1324_v5  ;;  %v1408_v5 = vsel %vm3107_vm6, %v1405_v6, %v1402_v10  ;;  %v1251_v6 = vand.u32 2147483647, %v2883_v9 }
 0x3d6   :  { %v1083_v27 = vpop.xlane.xlu1 %1082  ;;  %v1283_v29 = vsub.f32 0.0, %v1251_v6 }
 0x3d7   :  { %2332 = vrsqrt.f32 %v1083_v27  ;;  %v1656_v27 = vadd.f32 %v1408_v5, %v3676_v60 }
 0x3d8   :  { %v2319_v0 = vpop.eup %2318 }
 0x3d9   :  { %v1172_v8 = vmul.f32 %v2319_v0, %v2781_v35  ;;  %v3155_v22 = vpop.eup %2320  ;;  %v1687_v35 = vadd.f32 10.0, %v1655_v39  ;;  %v1688_v1 = vadd.f32 10.0, %v1656_v27  ;;  %v1435_v39 = vsel %vm3161_vm9, %v1432_v24, %v1429_v58 }
 0x3da   :  { %v1085_v26 = vpop.xlane.xlu0 %1084  ;;  %v2323_v41 = vpop.eup %2322  ;;  %v3680_v0 = vmax.f32 %v2822_v3, 0.0  ;;  %v3681_v27 = vmax.f32 %v2829_v14, 0.0 }
 0x3db   :  { %2334 = vrsqrt.f32 %v1085_v26  ;;  %v3677_v26 = vmax.f32 %v2815_v62, 0.0  ;;  %v1748_v16 = vsel %vm1010_vm0, %v1172_v8, %v1716_v11  ;;  %v1282_v11 = vsub.f32 0.0, %v1250_v47 }
 0x3dc   :  { %1780 = vst [vmem:[#allocation8] sm:$0xff] %v1748_v16  ;;  %v2325_v50 = vpop.eup %2324  ;;  %v1658_v17 = vadd.f32 %v1426_v63, %v3680_v0  ;;  %v1719_v18 = vsel %vm1011_vm3, %v1687_v35, 0.0  ;;  %v1253_v47 = vand.u32 2147483647, %v2895_v25  ;;  %v1659_v58 = vadd.f32 %v1435_v39, %v3681_v27 }
 0x3dd   :  { %v1657_v10 = vadd.f32 %v1417_v4, %v3677_v26  ;;  %v1463_v4 = vadd.f32 1.0, %v3155_v22  ;;  %v2327_v49 = vpop.eup %2326  ;;  %v1173_v8 = vmul.f32 %v2325_v50, %v2787_v43  ;;  %v1328_v26 = vmul.f32 1.442695, %v1282_v11 }
 0x3de   :  { %v1087_v28 = vpop.xlane.xlu1 %1086  ;;  %v1330_v16 = vmul.f32 1.442695, %v1283_v29  ;;  %v1690_v24 = vadd.f32 10.0, %v1658_v17  ;;  %v1691_v39 = vadd.f32 10.0, %v1659_v58  ;;  %v1438_v50 = vmul.f32 0.6931472, %v2323_v41 }
 0x3df   :  { %2336 = vrsqrt.f32 %v1087_v28  ;;  %v1689_v5 = vadd.f32 10.0, %v1657_v10  ;;  %v1749_v43 = vsel %vm1010_vm0, %v1173_v8, %v3123_v46 }
 0x3e0   :  { %v2329_v60 = vpop.eup %2328  ;;  %1781 = vst [vmem:[#allocation8 + $0x8] sm:$0xff] %v1749_v43  ;;  %v1722_v41 = vsel %vm1011_vm3, %v1690_v24, 0.0  ;;  %v1723_v27 = vsel %vm1011_vm3, %v1691_v39, 0.0  ;;  %v1460_v24 = vand.u32 2147483647, %v3130_v19 }
 0x3e1   :  { %v3185_v10 = vpop.eup %2330  ;;  %v1174_v35 = vmul.f32 %v2329_v60, %v2794_v51  ;;  %v1254_v51 = vand.u32 2147483647, %v2904_v36 }
 0x3e2   :  { %v1089_v30 = vpop.xlane.xlu0 %1088  ;;  %vm3234_vm12 = vcmp.lt.f32.partialorder %v1460_v24, 0.0004427343  ;;  %v1256_v24 = vand.u32 2147483647, %v2924_v61 }
 0x3e3   :  { %2338 = vrsqrt.f32 %v1089_v30  ;;  %v1442_v30 = vand.u32 2147483647, %v3072_v34  ;;  %v1750_v11 = vsel %vm1010_vm0, %v1174_v35, %v3136_v48  ;;  %v1286_v8 = vsub.f32 0.0, %v1254_v51 }
 0x3e4   :  { %2340 = vpow2.f32 %v1326_v21  ;;  %v1440_v21 = vadd.f32 1.0, %v1439_v52  ;;  %v1284_v52 = vsub.f32 0.0, %v1252_v33  ;;  %v2333_v63 = vpop.eup %2332  ;;  %v1449_v33 = vadd.f32 1.0, %v1448_v59  ;;  %1782 = vst [vmem:[#allocation8 + $0x10] sm:$0xff] %v1750_v11 }
 0x3e5   :  { %vm3181_vm10 = vcmp.lt.f32.partialorder %v1442_v30, 0.0004427343  ;;  %v1285_v30 = vsub.f32 0.0, %v1253_v47  ;;  %v1457_v47 = vmul.f32 -0.5, %v3130_v19 }
 0x3e6   :  { %v1091_v53 = vpop.xlane.xlu1 %1090  ;;  %v3179_v6 = vmul.f32 %v3072_v34, %v1440_v21  ;;  %v1721_v34 = vsel %vm1011_vm3, %v1689_v5, 0.0  ;;  %v1332_v21 = vmul.f32 1.442695, %v1284_v52 }
 0x3e7   :  { %2342 = vrsqrt.f32 %v1091_v53  ;;  %v1458_v53 = vadd.f32 1.0, %v1457_v47 }
 0x3e8   :  { %2344 = vlog2.f32 %v1454_v2  ;;  %v1720_v2 = vsel %vm1011_vm3, %v1688_v1, 0.0  ;;  %v2335_v28 = vpop.eup %2334  ;;  %v1175_v1 = vmul.f32 %v2333_v63, %v2801_v23  ;;  %v1472_v23 = vadd.f32 1.0, %v3185_v10 }
 0x3e9   :  { %2346 = vlog2.f32 %v1463_v4  ;;  %v1176_v29 = vmul.f32 %v2335_v28, %v2808_v56  ;;  %v1444_v58 = vsel %vm3181_vm10, %v3179_v6, %v1438_v50  ;;  %v1450_v63 = vmul.f32 %v3088_v37, %v1449_v33 }
 0x3ea   :  { %2348 = vpow2.f32 %v1328_v26  ;;  %v1751_v5 = vsel %vm1010_vm0, %v1175_v1, %v1719_v18  ;;  %v1093_v17 = vpop.xlane.xlu0 %1092  ;;  %v1334_v18 = vmul.f32 1.442695, %v1285_v30  ;;  %v1451_v26 = vand.u32 2147483647, %v3088_v37 }
 0x3eb   :  { %2350 = vpow2.f32 %v1330_v16  ;;  %1783 = vst [vmem:[#allocation8 + $0x18] sm:$0xff] %v1751_v5  ;;  %v1752_v4 = vsel %vm1010_vm0, %v1176_v29, %v1720_v2  ;;  %v1447_v2 = vmul.f32 0.6931472, %v2327_v49  ;;  %v1336_v49 = vmul.f32 1.442695, %v1286_v8 }
 0x3ec   :  { %v2337_v46 = vpop.eup %2336  ;;  %2352 = vrsqrt.f32 %v1093_v17  ;;  %1784 = vst [vmem:[#allocation8 + $0x20] sm:$0xff] %v1752_v4  ;;  %vm1452_vm11 = vcmp.lt.f32.partialorder %v1451_v26, 0.0004427343  ;;  %v1213_v1 = vmax.f32 %v2843_v31, 0.0  ;;  %v1466_v37 = vmul.f32 -0.5, %v3155_v22 }
 0x3ed   :  { %v1177_v0 = vmul.f32 %v2337_v46, %v2815_v62  ;;  %2354 = vpow2.f32 %v1332_v21  ;;  %v1453_v21 = vsel %vm1452_vm11, %v1450_v63, %v1447_v2  ;;  %v1459_v46 = vmul.f32 %v3130_v19, %v1458_v53 }
 0x3ee   :  { %2356 = vlog2.f32 %v1472_v23  ;;  %v1095_v6 = vpop.xlane.xlu1 %1094  ;;  %v1661_v50 = vadd.f32 %v1453_v21, %v1213_v1  ;;  %v1475_v5 = vmul.f32 -0.5, %v3185_v10  ;;  %v1469_v19 = vand.u32 2147483647, %v3155_v22 }
 0x3ef   :  { %v1753_v62 = vsel %vm1010_vm0, %v1177_v0, %v1721_v34  ;;  %2358 = vpow2.f32 %v1334_v18  ;;  %v1255_v34 = vand.u32 2147483647, %v2915_v15  ;;  %v1214_v4 = vmax.f32 %v2850_v40, 0.0 }
 0x3f0   :  { %v2339_v59 = vpop.eup %2338  ;;  %1785 = vst [vmem:[#allocation8 + $0x28] sm:$0xff] %v1753_v62  ;;  %2360 = vrsqrt.f32 %v1095_v6  ;;  %v1215_v18 = vmax.f32 %v2859_v42, 0.0  ;;  %v1216_v62 = vmax.f32 %v2862_v45, 0.0  ;;  %vm3255_vm13 = vcmp.lt.f32.partialorder %v1469_v19, 0.0004427343 }
 0x3f1   :  { %v3204_v48 = vpop.eup %2340  ;;  %v1178_v52 = vmul.f32 %v2339_v59, %v2822_v3  ;;  %v1287_v33 = vsub.f32 0.0, %v1255_v34  ;;  %v1217_v2 = vmax.f32 %v2865_v57, 0.0  ;;  %v1478_v6 = vand.u32 2147483647, %v3185_v10 }
 0x3f2   :  { %v1481_v16 = vadd.f32 1.0, %v3204_v48  ;;  %v1097_v51 = vpop.xlane.xlu0 %1096  ;;  %v1484_v53 = vmul.f32 -0.5, %v3204_v48  ;;  %v1257_v1 = vand.u32 2147483647, %v2930_v7 }
 0x3f3   :  { %v1754_v60 = vsel %vm1010_vm0, %v1178_v52, %v1722_v41  ;;  %v1467_v52 = vadd.f32 1.0, %v1466_v37  ;;  %vm3286_vm14 = vcmp.lt.f32.partialorder %v1478_v6, 0.0004427343 }
 0x3f4   :  { %v2343_v56 = vpop.eup %2342  ;;  %1786 = vst [vmem:[#allocation8 + $0x30] sm:$0xff] %v1754_v60  ;;  %2362 = vlog2.f32 %v1481_v16 }
 0x3f5   :  { %v1179_v3 = vmul.f32 %v2343_v56, %v2829_v14  ;;  %v2345_v35 = vpop.eup %2344  ;;  %v1212_v14 = vmax.f32 %v2838_v20, 0.0  ;;  %2364 = vpow2.f32 %v1336_v49  ;;  %v1338_v56 = vmul.f32 1.442695, %v1287_v33 }
 0x3f6   :  { %v1456_v30 = vmul.f32 0.6931472, %v2345_v35  ;;  %v2347_v11 = vpop.eup %2346  ;;  %2366 = vrsqrt.f32 %v1097_v51  ;;  %v1258_v51 = vand.u32 2147483647, %v2933_v54 }
 0x3f7   :  { %v1755_v43 = vsel %vm1010_vm0, %v1179_v3, %v1723_v27  ;;  %v1660_v28 = vadd.f32 %v1444_v58, %v1212_v14  ;;  %v3238_v29 = vpop.eup %2348  ;;  %v1693_v3 = vadd.f32 10.0, %v1661_v50  ;;  %v1476_v58 = vadd.f32 1.0, %v1475_v5 }
 0x3f8   :  { %1787 = vst [vmem:[#allocation8 + $0x38] sm:$0xff] %v1755_v43  ;;  %v3241_v0 = vpop.eup %2350  ;;  %v1462_v17 = vsel %vm3234_vm12, %v1459_v46, %v1456_v30  ;;  %v1490_v47 = vadd.f32 1.0, %v3238_v29  ;;  %v1465_v14 = vmul.f32 0.6931472, %v2347_v11  ;;  %2368 = vpow2.f32 %v1338_v56 }
 0x3f9   :  { %v1692_v59 = vadd.f32 10.0, %v1660_v28  ;;  %v2353_v23 = vpop.eup %2352  ;;  %v1662_v27 = vadd.f32 %v1462_v17, %v1214_v4  ;;  %v1499_v16 = vadd.f32 1.0, %v3241_v0  ;;  %v1725_v28 = vsel %vm1011_vm3, %v1693_v3, 0.0 }
 0x3fa   :  { %v3247_v41 = vpop.eup %2354  ;;  %v1180_v8 = vmul.f32 %v2353_v23, %v2838_v20  ;;  %v1468_v20 = vmul.f32 %v3155_v22, %v1467_v52  ;;  %2370 = vlog2.f32 %v1490_v47  ;;  %v1477_v22 = vmul.f32 %v3185_v10, %v1476_v58  ;;  %v1101_v17 = vpop.xlane.xlu0 %1100 }
 0x3fb   :  { %v1724_v60 = vsel %vm1011_vm3, %v1692_v59, 0.0  ;;  %v2357_v35 = vpop.eup %2356  ;;  %v1508_v63 = vadd.f32 1.0, %v3247_v41  ;;  %v1694_v21 = vadd.f32 10.0, %v1662_v27  ;;  %v1487_v30 = vand.u32 2147483647, %v3204_v48  ;;  %v1099_v59 = vpop.xlane.xlu1 %1098 }
 0x3fc   :  { %v1756_v43 = vsel %vm1010_vm0, %v1180_v8, %v1724_v60  ;;  %v3265_v34 = vpop.eup %2358  ;;  %v1474_v11 = vmul.f32 0.6931472, %v2357_v35  ;;  %2372 = vlog2.f32 %v1499_v16  ;;  %v1471_v46 = vsel %vm3255_vm13, %v1468_v20, %v1465_v14 }
 0x3fd   :  { %1788 = vst [vmem:[#allocation8 + $0x40] sm:$0xff] %v1756_v43  ;;  %v2361_v49 = vpop.eup %2360  ;;  %2374 = vlog2.f32 %v1508_v63  ;;  %v1517_v39 = vadd.f32 1.0, %v3265_v34  ;;  %v1485_v50 = vadd.f32 1.0, %v1484_v53  ;;  %v1288_v10 = vsub.f32 0.0, %v1256_v24 }
 0x3fe   :  { %v1181_v37 = vmul.f32 %v2361_v49, %v2843_v31  ;;  %2376 = vrsqrt.f32 %v1099_v59  ;;  %v1726_v31 = vsel %vm1011_vm3, %v1694_v21, 0.0  ;;  %vm3290_vm15 = vcmp.lt.f32.partialorder %v1487_v30, 0.0004427343 }
 0x3ff   :  { %2378 = vrsqrt.f32 %v1101_v17  ;;  %v1663_v56 = vadd.f32 %v1471_v46, %v1215_v18  ;;  %v1480_v47 = vsel %vm3286_vm14, %v1477_v22, %v1474_v11  ;;  %v1289_v60 = vsub.f32 0.0, %v1257_v1  ;;  %v1103_v26 = vpop.xlane.xlu1 %1102 }
 0x400   :  { %v1757_v5 = vsel %vm1010_vm0, %v1181_v37, %v1725_v28  ;;  %v1493_v3 = vmul.f32 -0.5, %v3238_v29  ;;  %2380 = vlog2.f32 %v1517_v39  ;;  %v1290_v27 = vsub.f32 0.0, %v1258_v51 }
 0x401   :  { %v2363_v33 = vpop.eup %2362  ;;  %1789 = vst [vmem:[#allocation8 + $0x48] sm:$0xff] %v1757_v5  ;;  %v1486_v16 = vmul.f32 %v3204_v48, %v1485_v50  ;;  %v1502_v43 = vmul.f32 -0.5, %v3241_v0  ;;  %v1340_v35 = vmul.f32 1.442695, %v1288_v10  ;;  %2382 = vrsqrt.f32 %v1103_v26 }
 0x402   :  { %v3282_v19 = vpop.eup %2364  ;;  %v1483_v8 = vmul.f32 0.6931472, %v2363_v33  ;;  %v1664_v14 = vadd.f32 %v1480_v47, %v1216_v62  ;;  %v1511_v18 = vmul.f32 -0.5, %v3247_v41  ;;  %v1695_v6 = vadd.f32 10.0, %v1663_v56  ;;  %v1105_v17 = vpop.xlane.xlu0 %1104 }
 0x403   :  { %v2367_v52 = vpop.eup %2366  ;;  %v1526_v20 = vadd.f32 1.0, %v3282_v19  ;;  %v1342_v24 = vmul.f32 1.442695, %v1289_v60  ;;  %v1218_v48 = vmax.f32 %v2880_v12, 0.0  ;;  %v1494_v49 = vadd.f32 1.0, %v1493_v3 }
 0x404   :  { %v1182_v58 = vmul.f32 %v2367_v52, %v2850_v40  ;;  %v1489_v53 = vsel %vm3290_vm15, %v1486_v16, %v1483_v8  ;;  %v1496_v40 = vand.u32 2147483647, %v3238_v29  ;;  %v1505_v62 = vand.u32 2147483647, %v3241_v0 }
 0x405   :  { %v1344_v28 = vmul.f32 1.442695, %v1290_v27  ;;  %v3309_v21 = vpop.eup %2368  ;;  %v1219_v22 = vmax.f32 %v2883_v9, 0.0  ;;  %v1503_v30 = vadd.f32 1.0, %v1502_v43  ;;  %v1514_v11 = vand.u32 2147483647, %v3247_v41 }
 0x406   :  { %v1758_v63 = vsel %vm1010_vm0, %v1182_v58, %v1726_v31  ;;  %2384 = vpow2.f32 %v1340_v35  ;;  %v1696_v37 = vadd.f32 10.0, %v1664_v14  ;;  %v1665_v33 = vadd.f32 %v1489_v53, %v1217_v2  ;;  %v1107_v14 = vpop.xlane.xlu1 %1106 }
 0x407   :  { %1790 = vst [vmem:[#allocation8 + $0x50] sm:$0xff] %v1758_v63  ;;  %v2371_v1 = vpop.eup %2370  ;;  %v1512_v46 = vadd.f32 1.0, %v1511_v18  ;;  %2386 = vlog2.f32 %v1526_v20  ;;  %v1727_v39 = vsel %vm1011_vm3, %v1695_v6, 0.0  ;;  %vm3317_vm1 = vcmp.lt.f32.partialorder %v1496_v40, 0.0004427343 }
 0x408   :  { %v1220_v59 = vmax.f32 %v2888_v55, 0.0  ;;  %2388 = vpow2.f32 %v1342_v24  ;;  %v1495_v10 = vmul.f32 %v3238_v29, %v1494_v49  ;;  %vm3323_vm2 = vcmp.lt.f32.partialorder %v1505_v62, 0.0004427343 }
 0x409   :  { %v2373_v50 = vpop.eup %2372  ;;  %v1535_v2 = vadd.f32 1.0, %v3309_v21  ;;  %2390 = vpow2.f32 %v1344_v28  ;;  %v1492_v23 = vmul.f32 0.6931472, %v2371_v1  ;;  %v1504_v4 = vmul.f32 %v3241_v0, %v1503_v30 }
 0x40a   :  { %v2375_v31 = vpop.eup %2374  ;;  %vm3329_vm4 = vcmp.lt.f32.partialorder %v1514_v11, 0.0004427343  ;;  %2392 = vrsqrt.f32 %v1105_v17  ;;  %v1728_v29 = vsel %vm1011_vm3, %v1696_v37, 0.0  ;;  %v1697_v47 = vadd.f32 10.0, %v1665_v33  ;;  %v1109_v6 = vpop.xlane.xlu0 %1108 }
 0x40b   :  { %v2377_v56 = vpop.eup %2376  ;;  %v1513_v8 = vmul.f32 %v3247_v41, %v1512_v46  ;;  %v1520_v60 = vmul.f32 -0.5, %v3265_v34  ;;  %v1501_v27 = vmul.f32 0.6931472, %v2373_v50  ;;  %v1529_v58 = vmul.f32 -0.5, %v3282_v19 }
 0x40c   :  { %v2379_v3 = vpop.eup %2378  ;;  %v1259_v0 = vand.u32 2147483647, %v2952_v38  ;;  %v1183_v26 = vmul.f32 %v2377_v56, %v2859_v42  ;;  %v1510_v16 = vmul.f32 0.6931472, %v2375_v31  ;;  %2394 = vlog2.f32 %v1535_v2 }
 0x40d   :  { %v1260_v43 = vand.u32 2147483647, %v2962_v13  ;;  %v1184_v35 = vmul.f32 %v2379_v3, %v2862_v45  ;;  %v2381_v18 = vpop.eup %2380  ;;  %v1498_v41 = vsel %vm3317_vm1, %v1495_v10, %v1492_v23  ;;  %v1261_v20 = vand.u32 2147483647, %v2965_v44 }
 0x40e   :  { %v1759_v63 = vsel %vm1010_vm0, %v1183_v26, %v1727_v39  ;;  %2396 = vrsqrt.f32 %v1107_v14  ;;  %v2383_v53 = vpop.eup %2382  ;;  %v1521_v42 = vadd.f32 1.0, %v1520_v60  ;;  %v1523_v40 = vand.u32 2147483647, %v3265_v34  ;;  %v1111_v2 = vpop.xlane.xlu1 %1110 }
 0x40f   :  { %1791 = vst [vmem:[#allocation8 + $0x58] sm:$0xff] %v1759_v63  ;;  %v1760_v45 = vsel %vm1010_vm0, %v1184_v35, %v1728_v29  ;;  %2398 = vrsqrt.f32 %v1109_v6  ;;  %v1507_v24 = vsel %vm3323_vm2, %v1504_v4, %v1501_v27  ;;  %v1532_v49 = vand.u32 2147483647, %v3282_v19  ;;  %v3700_v4 = vld [vmem:[#allocation12_spill] sm:$0xff] }
 0x410   :  { %v1291_v62 = vsub.f32 0.0, %v1259_v0  ;;  %1792 = vst [vmem:[#allocation8 + $0x60] sm:$0xff] %v1760_v45  ;;  %v1185_v28 = vmul.f32 %v2383_v53, %v2865_v57  ;;  %v1729_v30 = vsel %vm1011_vm3, %v1697_v47, 0.0  ;;  %v1666_v11 = vadd.f32 %v1498_v41, %v1218_v48 }
 0x411   :  { %v1516_v1 = vsel %vm3329_vm4, %v1513_v8, %v1510_v16  ;;  %v1292_v37 = vsub.f32 0.0, %v1260_v43  ;;  %v1519_v33 = vmul.f32 0.6931472, %v2381_v18  ;;  %v1530_v46 = vadd.f32 1.0, %v1529_v58 }
 0x412   :  { %v1293_v39 = vsub.f32 0.0, %v1261_v20  ;;  %v1761_v51 = vsel %vm1010_vm0, %v1185_v28, %v1729_v30  ;;  %v1667_v10 = vadd.f32 %v1507_v24, %v1219_v22  ;;  %v1221_v57 = vmax.f32 %v2895_v25, 0.0  ;;  %v1113_v58 = vpop.xlane.xlu0 %1112  ;;  %v3703_v24 = vld [vmem:[#allocation13_spill] sm:$0xff] }
 0x413   :  { %v3360_v50 = vpop.eup %2384  ;;  %v1522_v5 = vmul.f32 %v3265_v34, %v1521_v42  ;;  %vm3366_vm5 = vcmp.lt.f32.partialorder %v1523_v40, 0.0004427343  ;;  %1793 = vst [vmem:[#allocation8 + $0x68] sm:$0xff] %v1761_v51  ;;  %v1668_v31 = vadd.f32 %v1516_v1, %v1220_v59  ;;  %v1346_v23 = vmul.f32 1.442695, %v1291_v62 }
 0x414   :  { %v2387_v17 = vpop.eup %2386  ;;  %v1262_v52 = vand.u32 2147483647, %v3700_v4  ;;  %2400 = vrsqrt.f32 %v1111_v2  ;;  %v1698_v29 = vadd.f32 10.0, %v1666_v11  ;;  %v1222_v22 = vmax.f32 %v2904_v36, 0.0 }
 0x415   :  { %v3371_v56 = vpop.eup %2388  ;;  %vm3374_vm6 = vcmp.lt.f32.partialorder %v1532_v49, 0.0004427343  ;;  %v1348_v34 = vmul.f32 1.442695, %v1292_v37  ;;  %v1525_v60 = vsel %vm3366_vm5, %v1522_v5, %v1519_v33  ;;  %v1531_v59 = vmul.f32 %v3282_v19, %v1530_v46  ;;  %v3704_v33 = vld [vmem:[#allocation14_spill] sm:$0xff] }
 0x416   :  { %v3378_v8 = vpop.eup %2390  ;;  %v1538_v3 = vmul.f32 -0.5, %v3309_v21  ;;  %v1350_v27 = vmul.f32 1.442695, %v1293_v39  ;;  %v1699_v26 = vadd.f32 10.0, %v1667_v10  ;;  %v1528_v16 = vmul.f32 0.6931472, %v2387_v17  ;;  %v1115_v48 = vpop.xlane.xlu1 %1114 }
 0x417   :  { %v2393_v0 = vpop.eup %2392  ;;  %v1544_v43 = vadd.f32 1.0, %v3360_v50  ;;  %2402 = vrsqrt.f32 %v1113_v58  ;;  %v1700_v35 = vadd.f32 10.0, %v1668_v31  ;;  %v1294_v14 = vsub.f32 0.0, %v1262_v52  ;;  %v3705_v10 = vld [vmem:[#allocation15_spill] sm:$0xff] }
 0x418   :  { %2404 = vpow2.f32 %v1346_v23  ;;  %v1186_v18 = vmul.f32 %v2393_v0, %v2880_v12  ;;  %v1730_v41 = vsel %vm1011_vm3, %v1698_v29, 0.0  ;;  %v1669_v20 = vadd.f32 %v1525_v60, %v1221_v57 }
 0x419   :  { %v1553_v19 = vadd.f32 1.0, %v3371_v56  ;;  %2406 = vpow2.f32 %v1348_v34  ;;  %v2395_v63 = vpop.eup %2394  ;;  %v1541_v6 = vand.u32 2147483647, %v3309_v21  ;;  %v1562_v53 = vadd.f32 1.0, %v3378_v8 }
 0x41a   :  { %2408 = vpow2.f32 %v1350_v27  ;;  %v1762_v42 = vsel %vm1010_vm0, %v1186_v18, %v1730_v41  ;;  %v1534_v12 = vsel %vm3374_vm6, %v1531_v59, %v1528_v16  ;;  %v1539_v45 = vadd.f32 1.0, %v1538_v3  ;;  %v3708_v16 = vld [vmem:[#allocation16_spill] sm:$0xff] }
 0x41b   :  { %v2397_v40 = vpop.eup %2396  ;;  %2410 = vlog2.f32 %v1544_v43  ;;  %v1263_v49 = vand.u32 2147483647, %v3703_v24  ;;  %1794 = vst [vmem:[#allocation8 + $0x70] sm:$0xff] %v1762_v42  ;;  %v1731_v28 = vsel %vm1011_vm3, %v1699_v26, 0.0  ;;  %v1732_v30 = vsel %vm1011_vm3, %v1700_v35, 0.0 }
 0x41c   :  { %v2399_v62 = vpop.eup %2398  ;;  %v1352_v11 = vmul.f32 1.442695, %v1294_v14  ;;  %v1187_v1 = vmul.f32 %v2397_v40, %v2883_v9  ;;  %v1701_v37 = vadd.f32 10.0, %v1669_v20  ;;  %2412 = vlog2.f32 %v1553_v19 }
 0x41d   :  { %v1264_v46 = vand.u32 2147483647, %v3704_v33  ;;  %v1188_v39 = vmul.f32 %v2399_v62, %v2888_v55  ;;  %v1670_v51 = vadd.f32 %v1534_v12, %v1222_v22  ;;  %2414 = vlog2.f32 %v1562_v53 }
 0x41e   :  { %v1265_v57 = vand.u32 2147483647, %v3705_v10  ;;  %v1763_v5 = vsel %vm1010_vm0, %v1187_v1, %v1731_v28  ;;  %v1537_v2 = vmul.f32 0.6931472, %v2395_v63  ;;  %v1295_v17 = vsub.f32 0.0, %v1263_v49  ;;  %v1117_v1 = vpop.xlane.xlu0 %1116 }
 0x41f   :  { %1795 = vst [vmem:[#allocation8 + $0x78] sm:$0xff] %v1763_v5  ;;  %v1764_v9 = vsel %vm1010_vm0, %v1188_v39, %v1732_v30  ;;  %2416 = vrsqrt.f32 %v1115_v48  ;;  %v1540_v55 = vmul.f32 %v3309_v21, %v1539_v45  ;;  %v1296_v23 = vsub.f32 0.0, %v1264_v46  ;;  %v3709_v45 = vld [vmem:[#allocation17_spill] sm:$0xff] }
 0x420   :  { %2418 = vpow2.f32 %v1352_v11  ;;  %1796 = vst [vmem:[#allocation8 + $0x80] sm:$0xff] %v1764_v9  ;;  %v1702_v52 = vadd.f32 10.0, %v1670_v51  ;;  %vm3409_vm7 = vcmp.lt.f32.partialorder %v1541_v6, 0.0004427343  ;;  %v1297_v22 = vsub.f32 0.0, %v1265_v57 }
 0x421   :  { %v2401_v31 = vpop.eup %2400  ;;  %v1733_v34 = vsel %vm1011_vm3, %v1701_v37, 0.0  ;;  %v1543_v60 = vsel %vm3409_vm7, %v1540_v55, %v1537_v2  ;;  %v1354_v59 = vmul.f32 1.442695, %v1295_v17  ;;  %v1223_v27 = vmax.f32 %v2915_v15, 0.0 }
 0x422   :  { %v1189_v47 = vmul.f32 %v2401_v31, %v2895_v25  ;;  %v1547_v21 = vmul.f32 -0.5, %v3360_v50  ;;  %v1356_v26 = vmul.f32 1.442695, %v1296_v23  ;;  %v1266_v25 = vand.u32 2147483647, %v3708_v16 }
 0x423   :  { %v1734_v14 = vsel %vm1011_vm3, %v1702_v52, 0.0  ;;  %v1671_v18 = vadd.f32 %v1543_v60, %v1223_v27  ;;  %v1358_v41 = vmul.f32 1.442695, %v1297_v22  ;;  %v1550_v19 = vand.u32 2147483647, %v3360_v50  ;;  %v1119_v22 = vpop.xlane.xlu1 %1118  ;;  %v1121_v60 = vpop.xlane.xlu0 %1120 }
 0x424   :  { %v2403_v3 = vpop.eup %2402  ;;  %v1765_v58 = vsel %vm1010_vm0, %v1189_v47, %v1733_v34  ;;  %2420 = vpow2.f32 %v1354_v59  ;;  %v1548_v53 = vadd.f32 1.0, %v1547_v21  ;;  %v1556_v42 = vmul.f32 -0.5, %v3371_v56 }
 0x425   :  { %v3422_v0 = vpop.eup %2404  ;;  %1797 = vst [vmem:[#allocation8 + $0x88] sm:$0xff] %v1765_v58  ;;  %v1190_v43 = vmul.f32 %v2403_v3, %v2904_v36  ;;  %2422 = vpow2.f32 %v1356_v26  ;;  %v1298_v12 = vsub.f32 0.0, %v1266_v25  ;;  %v1267_v49 = vand.u32 2147483647, %v3709_v45 }
 0x426   :  { %v3426_v35 = vpop.eup %2406  ;;  %v1571_v36 = vadd.f32 1.0, %v3422_v0  ;;  %v1703_v28 = vadd.f32 10.0, %v1671_v18  ;;  %v1565_v30 = vmul.f32 -0.5, %v3378_v8  ;;  %2424 = vpow2.f32 %v1358_v41 }
 0x427   :  { %v3430_v20 = vpop.eup %2408  ;;  %v1766_v63 = vsel %vm1010_vm0, %v1190_v43, %v1734_v14  ;;  %v1580_v40 = vadd.f32 1.0, %v3426_v35  ;;  %v1224_v46 = vmax.f32 %v2924_v61, 0.0  ;;  %vm3442_vm8 = vcmp.lt.f32.partialorder %v1550_v19, 0.0004427343 }
 0x428   :  { %v2411_v6 = vpop.eup %2410  ;;  %1798 = vst [vmem:[#allocation8 + $0x90] sm:$0xff] %v1766_v63  ;;  %v1589_v11 = vadd.f32 1.0, %v3430_v20  ;;  %2426 = vrsqrt.f32 %v1117_v1  ;;  %v1549_v5 = vmul.f32 %v3360_v50, %v1548_v53  ;;  %v1557_v48 = vadd.f32 1.0, %v1556_v42 }
 0x429   :  { %v2413_v62 = vpop.eup %2412  ;;  %v1546_v39 = vmul.f32 0.6931472, %v2411_v6  ;;  %v1559_v2 = vand.u32 2147483647, %v3371_v56  ;;  %2428 = vlog2.f32 %v1571_v36  ;;  %v1360_v9 = vmul.f32 1.442695, %v1298_v12 }
 0x42a   :  { %v2415_v37 = vpop.eup %2414  ;;  %2430 = vlog2.f32 %v1580_v40  ;;  %v1299_v31 = vsub.f32 0.0, %v1267_v49  ;;  %v1735_v23 = vsel %vm1011_vm3, %v1703_v28, 0.0  ;;  %v1555_v52 = vmul.f32 0.6931472, %v2413_v62 }
 0x42b   :  { %v1566_v29 = vadd.f32 1.0, %v1565_v30  ;;  %2432 = vlog2.f32 %v1589_v11  ;;  %v1552_v50 = vsel %vm3442_vm8, %v1549_v5, %v1546_v39  ;;  %v1568_v47 = vand.u32 2147483647, %v3378_v8 }
 0x42c   :  { %v2417_v57 = vpop.eup %2416  ;;  %2434 = vrsqrt.f32 %v1119_v22  ;;  %v1558_v59 = vmul.f32 %v3371_v56, %v1557_v48  ;;  %vm1560_vm9 = vcmp.lt.f32.partialorder %v1559_v2, 0.0004427343  ;;  %v1362_v27 = vmul.f32 1.442695, %v1299_v31  ;;  %v1123_v48 = vpop.xlane.xlu1 %1122 }
 0x42d   :  { %v3448_v17 = vpop.eup %2418  ;;  %v1191_v55 = vmul.f32 %v2417_v57, %v2915_v15  ;;  %v1564_v15 = vmul.f32 0.6931472, %v2415_v37  ;;  %2436 = vrsqrt.f32 %v1121_v60  ;;  %v1672_v21 = vadd.f32 %v1552_v50, %v1224_v46 }
 0x42e   :  { %v1598_v3 = vadd.f32 1.0, %v3448_v17  ;;  %2438 = vpow2.f32 %v1360_v9  ;;  %v1561_v58 = vsel %vm1560_vm9, %v1558_v59, %v1555_v52  ;;  %v1567_v26 = vmul.f32 %v3378_v8, %v1566_v29 }
 0x42f   :  { %v1767_v34 = vsel %vm1010_vm0, %v1191_v55, %v1735_v23  ;;  %v1225_v25 = vmax.f32 %v2930_v7, 0.0  ;;  %vm1569_vm10 = vcmp.lt.f32.partialorder %v1568_v47, 0.0004427343  ;;  %v1226_v18 = vmax.f32 %v2933_v54, 0.0 }
 0x430   :  { %1799 = vst [vmem:[#allocation8 + $0x98] sm:$0xff] %v1767_v34  ;;  %v1570_v14 = vsel %vm1569_vm10, %v1567_v26, %v1564_v15  ;;  %2440 = vlog2.f32 %v1598_v3  ;;  %v1574_v41 = vmul.f32 -0.5, %v3422_v0  ;;  %v1704_v63 = vadd.f32 10.0, %v1672_v21 }
 0x431   :  { %v3462_v43 = vpop.eup %2420  ;;  %v1673_v56 = vadd.f32 %v1561_v58, %v1225_v25  ;;  %2442 = vpow2.f32 %v1362_v27  ;;  %v1674_v53 = vadd.f32 %v1570_v14, %v1226_v18  ;;  %v1577_v36 = vand.u32 2147483647, %v3422_v0  ;;  %v1127_v27 = vpop.xlane.xlu1 %1126 }
 0x432   :  { %v3466_v19 = vpop.eup %2422  ;;  %v1607_v8 = vadd.f32 1.0, %v3462_v43  ;;  %v1575_v49 = vadd.f32 1.0, %v1574_v41  ;;  %v1583_v62 = vmul.f32 -0.5, %v3426_v35  ;;  %v1736_v11 = vsel %vm1011_vm3, %v1704_v63, 0.0 }
 0x433   :  { %v3468_v6 = vpop.eup %2424  ;;  %v1705_v12 = vadd.f32 10.0, %v1673_v56  ;;  %v1227_v1 = vmax.f32 %v2952_v38, 0.0  ;;  %v1592_v37 = vmul.f32 -0.5, %v3430_v20  ;;  %v1616_v46 = vadd.f32 1.0, %v3466_v19 }
 0x434   :  { %v1706_v51 = vadd.f32 10.0, %v1674_v53  ;;  %2444 = vlog2.f32 %v1607_v8  ;;  %v1625_v57 = vadd.f32 1.0, %v3468_v6  ;;  %vm3482_vm11 = vcmp.lt.f32.partialorder %v1577_v36, 0.0004427343 }
 0x435   :  { %v2427_v42 = vpop.eup %2426  ;;  %v1586_v31 = vand.u32 2147483647, %v3426_v35  ;;  %2446 = vrsqrt.f32 %v1123_v48  ;;  %v1737_v23 = vsel %vm1011_vm3, %v1705_v12, 0.0  ;;  %v1576_v52 = vmul.f32 %v3422_v0, %v1575_v49  ;;  %v1125_v0 = vpop.xlane.xlu0 %1124 }
 0x436   :  { %v2429_v40 = vpop.eup %2428  ;;  %v1192_v28 = vmul.f32 %v2427_v42, %v2924_v61  ;;  %v1584_v29 = vadd.f32 1.0, %v1583_v62  ;;  %v1593_v47 = vadd.f32 1.0, %v1592_v37  ;;  %v1601_v34 = vmul.f32 -0.5, %v3448_v17 }
 0x437   :  { %v2431_v30 = vpop.eup %2430  ;;  %v1573_v2 = vmul.f32 0.6931472, %v2429_v40  ;;  %2448 = vlog2.f32 %v1616_v46  ;;  %v1738_v59 = vsel %vm1011_vm3, %v1706_v51, 0.0  ;;  %v1595_v21 = vand.u32 2147483647, %v3430_v20 }
 0x438   :  { %v2433_v39 = vpop.eup %2432  ;;  %v1768_v5 = vsel %vm1010_vm0, %v1192_v28, %v1736_v11  ;;  %v1582_v15 = vmul.f32 0.6931472, %v2431_v30  ;;  %2450 = vlog2.f32 %v1625_v57  ;;  %v1585_v26 = vmul.f32 %v3426_v35, %v1584_v29  ;;  %v1131_v9 = vpop.xlane.xlu1 %1130 }
 0x439   :  { %v2435_v61 = vpop.eup %2434  ;;  %1800 = vst [vmem:[#allocation8 + $0xa0] sm:$0xff] %v1768_v5  ;;  %2452 = vrsqrt.f32 %v1125_v0  ;;  %v1591_v25 = vmul.f32 0.6931472, %v2433_v39  ;;  %vm1587_vm12 = vcmp.lt.f32.partialorder %v1586_v31, 0.0004427343  ;;  %v1602_v18 = vadd.f32 1.0, %v1601_v34  ;;  %v1129_v42 = vpop.xlane.xlu0 %1128 }
 0x43a   :  { %v2437_v55 = vpop.eup %2436  ;;  %v1193_v22 = vmul.f32 %v2435_v61, %v2930_v7  ;;  %v1579_v7 = vsel %vm3482_vm11, %v1576_v52, %v1573_v2  ;;  %2454 = vrsqrt.f32 %v1127_v27  ;;  %v1588_v63 = vsel %vm1587_vm12, %v1585_v26, %v1582_v15 }
 0x43b   :  { %v3491_v50 = vpop.eup %2438  ;;  %v1194_v60 = vmul.f32 %v2437_v55, %v2933_v54  ;;  %v1675_v41 = vadd.f32 %v1579_v7, %v1227_v1  ;;  %v1594_v53 = vmul.f32 %v3430_v20, %v1593_v47  ;;  %v1604_v8 = vand.u32 2147483647, %v3448_v17 }
 0x43c   :  { %v1769_v3 = vsel %vm1010_vm0, %v1193_v22, %v1737_v23  ;;  %v1634_v14 = vadd.f32 1.0, %v3491_v50  ;;  %v1228_v36 = vmax.f32 %v2962_v13, 0.0  ;;  %vm1596_vm13 = vcmp.lt.f32.partialorder %v1595_v21, 0.0004427343 }
 0x43d   :  { %1801 = vst [vmem:[#allocation8 + $0xa8] sm:$0xff] %v1769_v3  ;;  %v1770_v58 = vsel %vm1010_vm0, %v1194_v60, %v1738_v59  ;;  %v2441_v54 = vpop.eup %2440  ;;  %2456 = vrsqrt.f32 %v1129_v42  ;;  %v1597_v40 = vsel %vm1596_vm13, %v1594_v53, %v1591_v25  ;;  %v1610_v12 = vmul.f32 -0.5, %v3462_v43 }
 0x43e   :  { %1802 = vst [vmem:[#allocation8 + $0xb0] sm:$0xff] %v1770_v58  ;;  %v3506_v56 = vpop.eup %2442  ;;  %v1600_v35 = vmul.f32 0.6931472, %v2441_v54  ;;  %2458 = vlog2.f32 %v1634_v14  ;;  %v1676_v62 = vadd.f32 %v1588_v63, %v1228_v36  ;;  %v1229_v28 = vmax.f32 %v2965_v44, 0.0 }
 0x43f   :  { %v1643_v49 = vadd.f32 1.0, %v3506_v56  ;;  %v1603_v30 = vmul.f32 %v3448_v17, %v1602_v18  ;;  %v1707_v20 = vadd.f32 10.0, %v1675_v41  ;;  %vm3515_vm14 = vcmp.lt.f32.partialorder %v1604_v8, 0.0004427343  ;;  %v1133_v41 = vpop.xlane.xlu0 %1132 }
 0x440   :  { %v1677_v37 = vadd.f32 %v1597_v40, %v1229_v28  ;;  %v1230_v51 = vmax.f32 %v3700_v4, 0.0  ;;  %v1611_v57 = vadd.f32 1.0, %v1610_v12  ;;  %v1613_v5 = vand.u32 2147483647, %v3462_v43 }
 0x441   :  { %v2445_v1 = vpop.eup %2444  ;;  %v1606_v46 = vsel %vm3515_vm14, %v1603_v30, %v1600_v35  ;;  %2460 = vlog2.f32 %v1643_v49  ;;  %v1708_v48 = vadd.f32 10.0, %v1676_v62  ;;  %v1619_v17 = vmul.f32 -0.5, %v3466_v19 }
 0x442   :  { %v2447_v39 = vpop.eup %2446  ;;  %v1628_v61 = vmul.f32 -0.5, %v3468_v6  ;;  %v1739_v55 = vsel %vm1011_vm3, %v1707_v20, 0.0  ;;  %v1678_v23 = vadd.f32 %v1606_v46, %v1230_v51  ;;  %v1609_v52 = vmul.f32 0.6931472, %v2445_v1 }
 0x443   :  { %v1195_v2 = vmul.f32 %v2447_v39, %v2952_v38  ;;  %2462 = vrsqrt.f32 %v1131_v9  ;;  %v1709_v22 = vadd.f32 10.0, %v1677_v37  ;;  %v1231_v60 = vmax.f32 %v3703_v24, 0.0  ;;  %v1137_v11 = vpop.xlane.xlu0 %1136 }
 0x444   :  { %v2449_v31 = vpop.eup %2448  ;;  %v1612_v59 = vmul.f32 %v3462_v43, %v1611_v57  ;;  %vm3532_vm15 = vcmp.lt.f32.partialorder %v1613_v5, 0.0004427343  ;;  %v1740_v3 = vsel %vm1011_vm3, %v1708_v48, 0.0  ;;  %v1620_v0 = vadd.f32 1.0, %v1619_v17 }
 0x445   :  { %v2451_v29 = vpop.eup %2450  ;;  %v1771_v47 = vsel %vm1010_vm0, %v1195_v2, %v1739_v55  ;;  %v1629_v27 = vadd.f32 1.0, %v1628_v61  ;;  %v1710_v21 = vadd.f32 10.0, %v1678_v23  ;;  %v1637_v54 = vmul.f32 -0.5, %v3491_v50 }
 0x446   :  { %v2453_v34 = vpop.eup %2452  ;;  %1803 = vst [vmem:[#allocation8 + $0xb8] sm:$0xff] %v1771_v47  ;;  %v1615_v58 = vsel %vm3532_vm15, %v1612_v59, %v1609_v52  ;;  %v1741_v26 = vsel %vm1011_vm3, %v1709_v22, 0.0  ;;  %v1622_v25 = vand.u32 2147483647, %v3466_v19  ;;  %v1631_v14 = vand.u32 2147483647, %v3468_v6 }
 0x447   :  { %v2455_v15 = vpop.eup %2454  ;;  %v1196_v7 = vmul.f32 %v2453_v34, %v2962_v13  ;;  %v1618_v63 = vmul.f32 0.6931472, %v2449_v31  ;;  %v1627_v53 = vmul.f32 0.6931472, %v2451_v29  ;;  %2464 = vrsqrt.f32 %v1133_v41 }
 0x448   :  { %v1197_v43 = vmul.f32 %v2455_v15, %v2965_v44  ;;  %v1135_v44 = vpop.xlane.xlu1 %1134  ;;  %v1679_v36 = vadd.f32 %v1615_v58, %v1231_v60  ;;  %v1621_v35 = vmul.f32 %v3466_v19, %v1620_v0  ;;  %v1742_v12 = vsel %vm1011_vm3, %v1710_v21, 0.0 }
 0x449   :  { %v1772_v18 = vsel %vm1010_vm0, %v1196_v7, %v1740_v3  ;;  %2466 = vrsqrt.f32 %v1135_v44  ;;  %v1630_v49 = vmul.f32 %v3468_v6, %v1629_v27  ;;  %v1638_v62 = vadd.f32 1.0, %v1637_v54 }
 0x44a   :  { %v2457_v13 = vpop.eup %2456  ;;  %1804 = vst [vmem:[#allocation8 + $0xc0] sm:$0xff] %v1772_v18  ;;  %v1773_v8 = vsel %vm1010_vm0, %v1197_v43, %v1741_v26  ;;  %v1646_v28 = vmul.f32 -0.5, %v3506_v56  ;;  %vm3557_vm1 = vcmp.lt.f32.partialorder %v1622_v25, 0.0004427343  ;;  %vm3561_vm2 = vcmp.lt.f32.partialorder %v1631_v14, 0.0004427343 }
 0x44b   :  { %v2459_v42 = vpop.eup %2458  ;;  %1805 = vst [vmem:[#allocation8 + $0xc8] sm:$0xff] %v1773_v8  ;;  %v1198_v40 = vmul.f32 %v2457_v13, %v3700_v4  ;;  %v1640_v19 = vand.u32 2147483647, %v3491_v50  ;;  %v1624_v6 = vsel %vm3557_vm1, %v1621_v35, %v1618_v63  ;;  %v1633_v1 = vsel %vm3561_vm2, %v1630_v49, %v1627_v53 }
 0x44c   :  { %v1636_v37 = vmul.f32 0.6931472, %v2459_v42  ;;  %2468 = vrsqrt.f32 %v1137_v11  ;;  %v1711_v39 = vadd.f32 10.0, %v1679_v36  ;;  %v1232_v51 = vmax.f32 %v3704_v33, 0.0  ;;  %v1139_v31 = vpop.xlane.xlu1 %1138 }
 0x44d   :  { %v1774_v4 = vsel %vm1010_vm0, %v1198_v40, %v1742_v12  ;;  %v1233_v57 = vmax.f32 %v3705_v10, 0.0  ;;  %v1639_v5 = vmul.f32 %v3491_v50, %v1638_v62  ;;  %v1647_v48 = vadd.f32 1.0, %v1646_v28 }
 0x44e   :  { %1806 = vst [vmem:[#allocation8 + $0xd0] sm:$0xff] %v1774_v4  ;;  %v2461_v46 = vpop.eup %2460  ;;  %v1680_v61 = vadd.f32 %v1624_v6, %v1232_v51  ;;  %vm1641_vm4 = vcmp.lt.f32.partialorder %v1640_v19, 0.0004427343  ;;  %v1649_v9 = vand.u32 2147483647, %v3506_v56  ;;  %2470 = vrsqrt.f32 %v1139_v31 }
 0x44f   :  { %v1681_v2 = vadd.f32 %v1633_v1, %v1233_v57  ;;  %v1642_v55 = vsel %vm1641_vm4, %v1639_v5, %v1636_v37  ;;  %v1645_v23 = vmul.f32 0.6931472, %v2461_v46  ;;  %v1743_v29 = vsel %vm1011_vm3, %v1711_v39, 0.0 }
 0x450   :  { %v2463_v17 = vpop.eup %2462  ;;  %v1234_v22 = vmax.f32 %v3708_v16, 0.0  ;;  %v1648_v50 = vmul.f32 %v3506_v56, %v1647_v48  ;;  %v1712_v34 = vadd.f32 10.0, %v1680_v61  ;;  %vm1650_vm5 = vcmp.lt.f32.partialorder %v1649_v9, 0.0004427343 }
 0x451   :  { %v1199_v52 = vmul.f32 %v2463_v17, %v3703_v24  ;;  %v1713_v59 = vadd.f32 10.0, %v1681_v2  ;;  %v1235_v24 = vmax.f32 %v3709_v45, 0.0 }
 0x452   :  { %v1682_v60 = vadd.f32 %v1642_v55, %v1234_v22  ;;  %v1651_v38 = vsel %vm1650_vm5, %v1648_v50, %v1645_v23  ;;  %v1744_v27 = vsel %vm1011_vm3, %v1712_v34, 0.0 }
 0x453   :  { %v1775_v47 = vsel %vm1010_vm0, %v1199_v52, %v1743_v29  ;;  %v1683_v56 = vadd.f32 %v1651_v38, %v1235_v24  ;;  %v1745_v58 = vsel %vm1011_vm3, %v1713_v59, 0.0 }
 0x454   :  { %1807 = vst [vmem:[#allocation8 + $0xd8] sm:$0xff] %v1775_v47  ;;  %v2465_v15 = vpop.eup %2464  ;;  %v1714_v7 = vadd.f32 10.0, %v1682_v60 }
 0x455   :  { %v1200_v0 = vmul.f32 %v2465_v15, %v3704_v33  ;;  %v1715_v14 = vadd.f32 10.0, %v1683_v56 }
 0x456   :  { %v2467_v3 = vpop.eup %2466  ;;  %v1746_v25 = vsel %vm1011_vm3, %v1714_v7, 0.0 }
 0x457   :  { %v1201_v21 = vmul.f32 %v2467_v3, %v3705_v10  ;;  %v1776_v54 = vsel %vm1010_vm0, %v1200_v0, %v1744_v27  ;;  %v1747_v13 = vsel %vm1011_vm3, %v1715_v14, 0.0 }
 0x458   :  { %1808 = vst [vmem:[#allocation8 + $0xe0] sm:$0xff] %v1776_v54 }
 0x459   :  { %v2469_v43 = vpop.eup %2468  ;;  %v1777_v26 = vsel %vm1010_vm0, %v1201_v21, %v1745_v58 }
 0x45a   :  { %1809 = vst [vmem:[#allocation8 + $0xe8] sm:$0xff] %v1777_v26  ;;  %v1202_v33 = vmul.f32 %v2469_v43, %v3708_v16 }
 0x45b   :  { %v2471_v18 = vpop.eup %2470 }
 0x45c   :  { %v1778_v10 = vsel %vm1010_vm0, %v1202_v33, %v1746_v25  ;;  %v1203_v41 = vmul.f32 %v2471_v18, %v3709_v45 }
 0x45d   :  { %1810 = vst [vmem:[#allocation8 + $0xf0] sm:$0xff] %v1778_v10 }
 0x45e   :  { %v1779_v16 = vsel %vm1010_vm0, %v1203_v41, %v1747_v13 }
 0x45f   :  { %1811 = vst [vmem:[#allocation8 + $0xf8] sm:$0xff] %v1779_v16 }
 0x460   :  { %2543 = shalt.err (!%p2540_p5)
}
 0x461   :  { %1823 = dma.vmem_to_hbm [thread:$0]  %s1818_s12, 4096, %s3615_s5, [#allocation4], %s2559_s21, %s2559_s21, %s2560_s22  }
 0x462   :  { %2556 = dma.done.wait [#allocation4], 4096  }
 0x463   :  { %2557 = vsyncadd [#allocation4], 4294963200 }
 0x464   :  { %1827 = vsyncpa [#allocation3], 1 }
 0x465   :  { %1828 = vsyncpa [#allocation6], 1 }
 0x466   :  { %1829 = vsyncpa [#allocation4], 1 }

</bundles_post_ra>
